<compile_context>
chip_gen: v6e
topology: v6e:2x2x1
jax: 0.10.0
libtpu: 0.0.40
codegen_flags: <defaults>
</compile_context>

<pallas_src>
import functools

import jax
import jax.numpy as jnp
from jax.experimental import pallas as pl
from jax.experimental.pallas import tpu as pltpu


def _parallel_conv_kernel(x_ref, w_ref, b_ref, o_ref, *, length, wp):
    """Fused Parallel(conv1x1, conv3x3) == single folded 3x3 conv.

    x_ref: (1, Hp*Wp, C)   padded + spatially-flattened NHWC image (compute dtype)
    w_ref: (9, C, Cout)    per-tap weights, tap k = 3*dh + dw (conv1x1 folded in)
    b_ref: (1, Cout)       combined bias b1+b2 (f32)
    o_ref: (1, H*Wp, Cout) output on the padded-width grid (garbage cols dropped
                           by the wrapper)
    """
    acc = None
    for k in range(9):
        dh, dw = divmod(k, 3)
        off = dh * wp + dw                       # static element offset
        xs = x_ref[0, off:off + length, :]       # (length, C) shifted view
        y = jnp.dot(xs, w_ref[k], preferred_element_type=jnp.float32)
        acc = y if acc is None else acc + y
    o_ref[0] = (acc + b_ref[...]).astype(o_ref.dtype)


@functools.partial(jax.jit, static_argnames=("compute_dtype",))
def parallel_forward(x_nchw, w1, b1, w2, b2, *, compute_dtype=jnp.bfloat16):
    """PyTorch-semantics forward of Parallel(conv1x1, conv3x3).

    x_nchw: (B, C, H, W) float32
    w1: (Cout, Cin)        conv1x1 weight (kernel dims squeezed)
    b1: (Cout,)
    w2: (Cout, Cin, 3, 3)  conv3x3 weight
    b2: (Cout,)
    returns: (B, Cout, H, W)
    """
    B, C, H, W = x_nchw.shape
    Cout = w2.shape[0]

    # ---- fold the 1x1 branch into the 3x3 center tap (exact) ----
    wf = w2.at[:, :, 1, 1].add(w1)                               # (Cout, Cin, 3, 3)
    b_comb = (b1 + b2).astype(jnp.float32).reshape(1, Cout)
    # tap-major weight stack: index k = 3*dh + dw -> (Cin, Cout)
    w_all = jnp.transpose(wf, (2, 3, 1, 0)).reshape(9, C, Cout).astype(compute_dtype)

    # ---- NHWC, pad spatially, flatten (Hp, Wp) -> Hp*Wp ----
    # Padding: H by (1, 2), W by (1, 1).  The extra bottom row guarantees every
    # tap's contiguous slice [dh*Wp+dw : dh*Wp+dw + H*Wp] stays in bounds.
    x_nhwc = jnp.transpose(x_nchw, (0, 2, 3, 1))                 # (B, H, W, C)
    Hp, Wp = H + 3, W + 2
    xp = jnp.pad(x_nhwc, ((0, 0), (1, 2), (1, 1), (0, 0))).astype(compute_dtype)
    xf = xp.reshape(B, Hp * Wp, C)                               # (B, Hp*Wp, C)
    L = H * Wp                                                   # padded-width rows

    out_padded = pl.pallas_call(
        functools.partial(_parallel_conv_kernel, length=L, wp=Wp),
        out_shape=jax.ShapeDtypeStruct((B, L, Cout), x_nchw.dtype),
        grid_spec=pltpu.PrefetchScalarGridSpec(
            num_scalar_prefetch=0,
            grid=(B,),
            in_specs=[
                pl.BlockSpec((1, Hp * Wp, C), lambda b: (b, 0, 0)),   # image slab
                pl.BlockSpec((9, C, Cout), lambda b: (0, 0, 0)),      # folded weights
                pl.BlockSpec((1, Cout), lambda b: (0, 0)),            # combined bias
            ],
            out_specs=pl.BlockSpec((1, L, Cout), lambda b: (b, 0, 0)),
        ),
        compiler_params=pltpu.CompilerParams(
            dimension_semantics=("parallel",),
            vmem_limit_bytes=48 * 1024 * 1024,
        ),
    )(xf, w_all, b_comb)

    # drop the padded-width garbage columns, go back to NCHW
    out = out_padded.reshape(B, H, Wp, Cout)[:, :, :W, :]
    return jnp.transpose(out, (0, 3, 1, 2))


def _reference(x_nchw, w1, b1, w2, b2):
    """Pure-JAX f32 reference: conv1x1(x) + conv3x3(x), NCHW."""
    y1 = jax.lax.conv_general_dilated(
        x_nchw, w1[:, :, None, None], window_strides=(1, 1), padding="VALID",
        dimension_numbers=("NCHW", "OIHW", "NCHW")) + b1[None, :, None, None]
    y2 = jax.lax.conv_general_dilated(
        x_nchw, w2, window_strides=(1, 1), padding=((1, 1), (1, 1)),
        dimension_numbers=("NCHW", "OIHW", "NCHW")) + b2[None, :, None, None]
    return y1 + y2


if __name__ == "__main__":
    key = jax.random.PRNGKey(0)
    kx, k1, k2, k3, k4 = jax.random.split(key, 5)

    B, C, H, W = 2, 4, 16, 16
    x = jax.random.normal(kx, (B, C, H, W), dtype=jnp.float32)

    # deterministic parameter init (synthetic; no checkpoint load)
    w1 = 0.1 * jax.random.normal(k1, (C, C), dtype=jnp.float32)        # conv1x1
    b1 = 0.1 * jax.random.normal(k2, (C,), dtype=jnp.float32)
    w2 = 0.1 * jax.random.normal(k3, (C, C, 3, 3), dtype=jnp.float32)  # conv3x3
    b2 = 0.1 * jax.random.normal(k4, (C,), dtype=jnp.float32)

    # default (bf16 compute, f32 accumulate)
    out = jax.block_until_ready(parallel_forward(x, w1, b1, w2, b2))
    ref = jax.block_until_ready(_reference(x, w1, b1, w2, b2))
    assert out.shape == (B, C, H, W)
    assert jnp.allclose(out, ref, atol=5e-2, rtol=5e-2), "bf16 mismatch vs reference"

    # exact-precision path to validate the folding / indexing bit-for-bit-ish
    out_f32 = jax.block_until_ready(
        parallel_forward(x, w1, b1, w2, b2, compute_dtype=jnp.float32))
    assert jnp.allclose(out_f32, ref, atol=1e-4, rtol=1e-4), "f32 mismatch vs reference"

    print("KERNEL_OK")
</pallas_src>

<mosaic_0001>
module attributes {stable_mosaic.version = 11 : i64} {
  func.func @_parallel_conv_kernel(%arg0: i32, %arg1: memref<1x342x4xbf16, #tpu.memory_space<vmem>>, %arg2: memref<9x4x4xbf16, #tpu.memory_space<vmem>>, %arg3: memref<1x4xf32, #tpu.memory_space<vmem>>, %arg4: memref<1x288x4xf32, #tpu.memory_space<vmem>>) attributes {dimension_semantics = [#tpu.dimension_semantics<parallel>], iteration_bounds = array<i64: 2>, scalar_prefetch = 0 : i64, scratch_operands = 0 : i64, tpu.core_type = #tpu.core_type<tc>, window_params = [{transform_indices = @transform_0, window_bounds = array<i64: 1, 342, 4>}, {pipeline_mode = #tpu.pipeline_mode<synchronous>, transform_indices = @transform_1, window_bounds = array<i64: 9, 4, 4>}, {pipeline_mode = #tpu.pipeline_mode<synchronous>, transform_indices = @transform_2, window_bounds = array<i64: 1, 4>}, {transform_indices = @transform_3, window_bounds = array<i64: 1, 288, 4>}]} {
    %c0 = arith.constant 0 : index
    %c0_0 = arith.constant 0 : index
    %c0_1 = arith.constant 0 : index
    %0 = vector.load %arg1[%c0, %c0_0, %c0_1] : memref<1x342x4xbf16, #tpu.memory_space<vmem>>, vector<1x288x4xbf16>
    %1 = vector.shape_cast %0 : vector<1x288x4xbf16> to vector<288x4xbf16>
    %c0_2 = arith.constant 0 : index
    %c0_3 = arith.constant 0 : index
    %c0_4 = arith.constant 0 : index
    %2 = vector.load %arg2[%c0_2, %c0_3, %c0_4] : memref<9x4x4xbf16, #tpu.memory_space<vmem>>, vector<1x4x4xbf16>
    %3 = vector.shape_cast %2 : vector<1x4x4xbf16> to vector<4x4xbf16>
    %cst = arith.constant dense<0.000000e+00> : vector<288x4xf32>
    %4 = tpu.matmul %1, %3, %cst {dimension_numbers = #tpu.dot_dimension_numbers<[1], [0], [0], [1], [0, 0, 1, 1], [], []>} : vector<288x4xbf16>, vector<4x4xbf16>, vector<288x4xf32> -> vector<288x4xf32>
    %c0_5 = arith.constant 0 : index
    %c1 = arith.constant 1 : index
    %c0_6 = arith.constant 0 : index
    %5 = vector.load %arg1[%c0_5, %c1, %c0_6] : memref<1x342x4xbf16, #tpu.memory_space<vmem>>, vector<1x288x4xbf16>
    %6 = vector.shape_cast %5 : vector<1x288x4xbf16> to vector<288x4xbf16>
    %c1_7 = arith.constant 1 : index
    %c0_8 = arith.constant 0 : index
    %c0_9 = arith.constant 0 : index
    %7 = vector.load %arg2[%c1_7, %c0_8, %c0_9] : memref<9x4x4xbf16, #tpu.memory_space<vmem>>, vector<1x4x4xbf16>
    %8 = vector.shape_cast %7 : vector<1x4x4xbf16> to vector<4x4xbf16>
    %cst_10 = arith.constant dense<0.000000e+00> : vector<288x4xf32>
    %9 = tpu.matmul %6, %8, %cst_10 {dimension_numbers = #tpu.dot_dimension_numbers<[1], [0], [0], [1], [0, 0, 1, 1], [], []>} : vector<288x4xbf16>, vector<4x4xbf16>, vector<288x4xf32> -> vector<288x4xf32>
    %10 = arith.addf %4, %9 : vector<288x4xf32>
    %c0_11 = arith.constant 0 : index
    %c2 = arith.constant 2 : index
    %c0_12 = arith.constant 0 : index
    %11 = vector.load %arg1[%c0_11, %c2, %c0_12] : memref<1x342x4xbf16, #tpu.memory_space<vmem>>, vector<1x288x4xbf16>
    %12 = vector.shape_cast %11 : vector<1x288x4xbf16> to vector<288x4xbf16>
    %c2_13 = arith.constant 2 : index
    %c0_14 = arith.constant 0 : index
    %c0_15 = arith.constant 0 : index
    %13 = vector.load %arg2[%c2_13, %c0_14, %c0_15] : memref<9x4x4xbf16, #tpu.memory_space<vmem>>, vector<1x4x4xbf16>
    %14 = vector.shape_cast %13 : vector<1x4x4xbf16> to vector<4x4xbf16>
    %cst_16 = arith.constant dense<0.000000e+00> : vector<288x4xf32>
    %15 = tpu.matmul %12, %14, %cst_16 {dimension_numbers = #tpu.dot_dimension_numbers<[1], [0], [0], [1], [0, 0, 1, 1], [], []>} : vector<288x4xbf16>, vector<4x4xbf16>, vector<288x4xf32> -> vector<288x4xf32>
    %16 = arith.addf %10, %15 : vector<288x4xf32>
    %c0_17 = arith.constant 0 : index
    %c18 = arith.constant 18 : index
    %c0_18 = arith.constant 0 : index
    %17 = vector.load %arg1[%c0_17, %c18, %c0_18] : memref<1x342x4xbf16, #tpu.memory_space<vmem>>, vector<1x288x4xbf16>
    %18 = vector.shape_cast %17 : vector<1x288x4xbf16> to vector<288x4xbf16>
    %c3 = arith.constant 3 : index
    %c0_19 = arith.constant 0 : index
    %c0_20 = arith.constant 0 : index
    %19 = vector.load %arg2[%c3, %c0_19, %c0_20] : memref<9x4x4xbf16, #tpu.memory_space<vmem>>, vector<1x4x4xbf16>
    %20 = vector.shape_cast %19 : vector<1x4x4xbf16> to vector<4x4xbf16>
    %cst_21 = arith.constant dense<0.000000e+00> : vector<288x4xf32>
    %21 = tpu.matmul %18, %20, %cst_21 {dimension_numbers = #tpu.dot_dimension_numbers<[1], [0], [0], [1], [0, 0, 1, 1], [], []>} : vector<288x4xbf16>, vector<4x4xbf16>, vector<288x4xf32> -> vector<288x4xf32>
    %22 = arith.addf %16, %21 : vector<288x4xf32>
    %c0_22 = arith.constant 0 : index
    %c19 = arith.constant 19 : index
    %c0_23 = arith.constant 0 : index
    %23 = vector.load %arg1[%c0_22, %c19, %c0_23] : memref<1x342x4xbf16, #tpu.memory_space<vmem>>, vector<1x288x4xbf16>
    %24 = vector.shape_cast %23 : vector<1x288x4xbf16> to vector<288x4xbf16>
    %c4 = arith.constant 4 : index
    %c0_24 = arith.constant 0 : index
    %c0_25 = arith.constant 0 : index
    %25 = vector.load %arg2[%c4, %c0_24, %c0_25] : memref<9x4x4xbf16, #tpu.memory_space<vmem>>, vector<1x4x4xbf16>
    %26 = vector.shape_cast %25 : vector<1x4x4xbf16> to vector<4x4xbf16>
    %cst_26 = arith.constant dense<0.000000e+00> : vector<288x4xf32>
    %27 = tpu.matmul %24, %26, %cst_26 {dimension_numbers = #tpu.dot_dimension_numbers<[1], [0], [0], [1], [0, 0, 1, 1], [], []>} : vector<288x4xbf16>, vector<4x4xbf16>, vector<288x4xf32> -> vector<288x4xf32>
    %28 = arith.addf %22, %27 : vector<288x4xf32>
    %c0_27 = arith.constant 0 : index
    %c20 = arith.constant 20 : index
    %c0_28 = arith.constant 0 : index
    %29 = vector.load %arg1[%c0_27, %c20, %c0_28] : memref<1x342x4xbf16, #tpu.memory_space<vmem>>, vector<1x288x4xbf16>
    %30 = vector.shape_cast %29 : vector<1x288x4xbf16> to vector<288x4xbf16>
    %c5 = arith.constant 5 : index
    %c0_29 = arith.constant 0 : index
    %c0_30 = arith.constant 0 : index
    %31 = vector.load %arg2[%c5, %c0_29, %c0_30] : memref<9x4x4xbf16, #tpu.memory_space<vmem>>, vector<1x4x4xbf16>
    %32 = vector.shape_cast %31 : vector<1x4x4xbf16> to vector<4x4xbf16>
    %cst_31 = arith.constant dense<0.000000e+00> : vector<288x4xf32>
    %33 = tpu.matmul %30, %32, %cst_31 {dimension_numbers = #tpu.dot_dimension_numbers<[1], [0], [0], [1], [0, 0, 1, 1], [], []>} : vector<288x4xbf16>, vector<4x4xbf16>, vector<288x4xf32> -> vector<288x4xf32>
    %34 = arith.addf %28, %33 : vector<288x4xf32>
    %c0_32 = arith.constant 0 : index
    %c36 = arith.constant 36 : index
    %c0_33 = arith.constant 0 : index
    %35 = vector.load %arg1[%c0_32, %c36, %c0_33] : memref<1x342x4xbf16, #tpu.memory_space<vmem>>, vector<1x288x4xbf16>
    %36 = vector.shape_cast %35 : vector<1x288x4xbf16> to vector<288x4xbf16>
    %c6 = arith.constant 6 : index
    %c0_34 = arith.constant 0 : index
    %c0_35 = arith.constant 0 : index
    %37 = vector.load %arg2[%c6, %c0_34, %c0_35] : memref<9x4x4xbf16, #tpu.memory_space<vmem>>, vector<1x4x4xbf16>
    %38 = vector.shape_cast %37 : vector<1x4x4xbf16> to vector<4x4xbf16>
    %cst_36 = arith.constant dense<0.000000e+00> : vector<288x4xf32>
    %39 = tpu.matmul %36, %38, %cst_36 {dimension_numbers = #tpu.dot_dimension_numbers<[1], [0], [0], [1], [0, 0, 1, 1], [], []>} : vector<288x4xbf16>, vector<4x4xbf16>, vector<288x4xf32> -> vector<288x4xf32>
    %40 = arith.addf %34, %39 : vector<288x4xf32>
    %c0_37 = arith.constant 0 : index
    %c37 = arith.constant 37 : index
    %c0_38 = arith.constant 0 : index
    %41 = vector.load %arg1[%c0_37, %c37, %c0_38] : memref<1x342x4xbf16, #tpu.memory_space<vmem>>, vector<1x288x4xbf16>
    %42 = vector.shape_cast %41 : vector<1x288x4xbf16> to vector<288x4xbf16>
    %c7 = arith.constant 7 : index
    %c0_39 = arith.constant 0 : index
    %c0_40 = arith.constant 0 : index
    %43 = vector.load %arg2[%c7, %c0_39, %c0_40] : memref<9x4x4xbf16, #tpu.memory_space<vmem>>, vector<1x4x4xbf16>
    %44 = vector.shape_cast %43 : vector<1x4x4xbf16> to vector<4x4xbf16>
    %cst_41 = arith.constant dense<0.000000e+00> : vector<288x4xf32>
    %45 = tpu.matmul %42, %44, %cst_41 {dimension_numbers = #tpu.dot_dimension_numbers<[1], [0], [0], [1], [0, 0, 1, 1], [], []>} : vector<288x4xbf16>, vector<4x4xbf16>, vector<288x4xf32> -> vector<288x4xf32>
    %46 = arith.addf %40, %45 : vector<288x4xf32>
    %c0_42 = arith.constant 0 : index
    %c38 = arith.constant 38 : index
    %c0_43 = arith.constant 0 : index
    %47 = vector.load %arg1[%c0_42, %c38, %c0_43] : memref<1x342x4xbf16, #tpu.memory_space<vmem>>, vector<1x288x4xbf16>
    %48 = vector.shape_cast %47 : vector<1x288x4xbf16> to vector<288x4xbf16>
    %c8 = arith.constant 8 : index
    %c0_44 = arith.constant 0 : index
    %c0_45 = arith.constant 0 : index
    %49 = vector.load %arg2[%c8, %c0_44, %c0_45] : memref<9x4x4xbf16, #tpu.memory_space<vmem>>, vector<1x4x4xbf16>
    %50 = vector.shape_cast %49 : vector<1x4x4xbf16> to vector<4x4xbf16>
    %cst_46 = arith.constant dense<0.000000e+00> : vector<288x4xf32>
    %51 = tpu.matmul %48, %50, %cst_46 {dimension_numbers = #tpu.dot_dimension_numbers<[1], [0], [0], [1], [0, 0, 1, 1], [], []>} : vector<288x4xbf16>, vector<4x4xbf16>, vector<288x4xf32> -> vector<288x4xf32>
    %52 = arith.addf %46, %51 : vector<288x4xf32>
    %c0_47 = arith.constant 0 : index
    %c0_48 = arith.constant 0 : index
    %53 = vector.load %arg3[%c0_47, %c0_48] : memref<1x4xf32, #tpu.memory_space<vmem>>, vector<1x4xf32>
    %54 = vector.broadcast %53 : vector<1x4xf32> to vector<288x4xf32>
    %55 = arith.addf %52, %54 : vector<288x4xf32>
    %c0_49 = arith.constant 0 : index
    %c0_50 = arith.constant 0 : index
    %c0_51 = arith.constant 0 : index
    %56 = vector.load %arg4[%c0_49, %c0_50, %c0_51] : memref<1x288x4xf32, #tpu.memory_space<vmem>>, vector<1x288x4xf32>
    %57 = vector.shape_cast %56 : vector<1x288x4xf32> to vector<288x4xf32>
    %58 = vector.shape_cast %55 : vector<288x4xf32> to vector<1x288x4xf32>
    tpu.vector_store %arg4[%c0_49, %c0_50, %c0_51], %58 {strides = array<i32>} : memref<1x288x4xf32, #tpu.memory_space<vmem>>, vector<1x288x4xf32>,
    return
  }
  func.func @transform_0(%arg0: i32) -> (i32, i32, i32) {
    %c0_i32 = arith.constant 0 : i32
    %c0_i32_0 = arith.constant 0 : i32
    %c0_i32_1 = arith.constant 0 : i32
    return %arg0, %c0_i32, %c0_i32_0 : i32, i32, i32
  }
  func.func @transform_1(%arg0: i32) -> (i32, i32, i32) {
    %c0_i32 = arith.constant 0 : i32
    %c0_i32_0 = arith.constant 0 : i32
    %c0_i32_1 = arith.constant 0 : i32
    %c0_i32_2 = arith.constant 0 : i32
    return %c0_i32, %c0_i32_0, %c0_i32_1 : i32, i32, i32
  }
  func.func @transform_2(%arg0: i32) -> (i32, i32) {
    %c0_i32 = arith.constant 0 : i32
    %c0_i32_0 = arith.constant 0 : i32
    %c0_i32_1 = arith.constant 0 : i32
    return %c0_i32, %c0_i32_0 : i32, i32
  }
  func.func @transform_3(%arg0: i32) -> (i32, i32, i32) {
    %c0_i32 = arith.constant 0 : i32
    %c0_i32_0 = arith.constant 0 : i32
    %c0_i32_1 = arith.constant 0 : i32
    return %arg0, %c0_i32, %c0_i32_0 : i32, i32, i32
  }
}

</mosaic_0001>

<bundles_post_ra>
// kernel: parallel_forward.1
= control target key start
LH: loop header
LB: loop body
LE: loop exit
PB: predicated region body
PF: predicated region fallthrough
CT: control target
= control target key end

     0   :  { %s4621_s12 = smov 0   ;;  %s6045_s0 = inlined_call_operand.vmem [shape: bf16[2,342,4], index: 0, kind: input, shape index: {}]   ;;  %s6046_s1 = inlined_call_operand.vmem [shape: bf16[9,4,4], index: 1, kind: input, shape index: {}]   ;;  %s6047_s2 = inlined_call_operand.vmem [shape: f32[1,4], index: 2, kind: input, shape index: {}]   ;;  %s6048_s3 = inlined_call_operand.vmem [shape: f32[2,288,4], index: 3, kind: output, shape index: {}]  }
   0x1 LB: > { %s3754_s13 = sadd.s32 4294967295, %s4599_s12   ;;  %p3758_p0 = scmp.ge.s32.totalorder %s4599_s12, 1  ;;  %s4599_s12 = sphi %s4621_s12, %s13_s12  }
   0x2   : > { %p137_p1 = scmp.lt.s32.totalorder %s4599_s12, 3 }
   0x4   : > { %p138_p2 = pnand %p3758_p0, %p137_p1 }
   0x6   : > { %141 = sbr.rel (%p138_p2) target bundleno = 552 (0x228), region = 32 }
   0xb   : > { %v3761_v0 = vld [vmem:[%s6046_s1 + $0x2] sm:$0x3]  ;;  %vm509_vm0 = vcmask 1041408   ;;  %p161_p3 = scmp.lt.s32.totalorder %s3754_s13, 1  ;;  %v3817_v2 = vld [vmem:[%s6046_s1 + $0x4] sm:$0x3] }
   0xc   : > { %4511 = vmatprep.subr.msk.bf16.mxu0 %vm509_vm0, %v3761_v0  ;;  %4512 = vmatprep.subr.msk.bf16.mxu1 %vm509_vm0, %v3761_v0  ;;  %v511_v1 = vsel %vm509_vm0, %v3761_v0, 0  ;;  %v208_v3 = vld [vmem:[%s6046_s1] sm:$0x3]  ;;  %vm305_vm1 = vsmask.f32 7424  ;;  %vm454_vm2 = vcmask 31744  }
   0xd   : > { %4168 = vmatpush3.bf16.msra.mxu0 %v511_v1  ;;  %4510 = vmatpush3.bf16.msra.mxu1 %v511_v1  ;;  %s6088_s13 = smov (!%p161_p3, %s3754_s13), 1  ;;  %v1005_v8 = vsel %vm509_vm0, %v3817_v2, 0  ;;  %v727_v16 = vsel %vm509_vm0, %v208_v3, 0  ;;  %v4694_v33 = vld [vmem:[%s6046_s1 + $0x8] sm:$0x3]  ;;  %vm912_vm3 = vcmask 1046528  }
   0xe   : > { %4514 = vmatprep.subr.msk.bf16.mxu0 %vm509_vm0, %v3817_v2  ;;  %4513 = vmatprep.subr.msk.bf16.mxu1 %vm509_vm0, %v208_v3  ;;  %s4521_s20 = smul.u32 172, %s6088_s13  ;;  %v4714_v45 = vld [vmem:[%s6046_s1 + $0x6] sm:$0x3]  ;;  %vm2112_vm4 = vcmask 1045504   ;;  %vm1665_vm5 = vsmask.f32 6400 }
   0xf   : > { %vm3312_vm6 = vcmask 1044480   ;;  %vm2865_vm7 = vsmask.f32 5376  ;;  %s4522_s9 = smul.u32 288, %s6088_s13 }
  0x10   : > { %s4649_s23 = scalar_lea.vmem %s6045_s0, %s4521_s20 }
  0x11   : > { %v172_v4 = vld [vmem:[%s4649_s23] sm:$0xf]  ;;  %v4653_v5 = vld [vmem:[%s4649_s23 + $0x4] sm:$0xf]  ;;  %v4659_v7 = vld [vmem:[%s4649_s23 + $0x8] sm:$0xff]   ;;  %s5898_s16 = scalar_lea.vmem %s6048_s3, %s4522_s9 }
  0x12   : > { %v4656_v6 = vcombine.low %v172_v4, %v4653_v5  ;;  %v314_v11 = vshll.u32 %v4659_v7, 16  ;;  %v318_v12 = vshrl.u32 %v4659_v7, 16  ;;  %v4667_v13 = vld [vmem:[%s4649_s23 + $0x50] sm:$0xff]   ;;  %v4670_v14 = vld [vmem:[%s4649_s23 + $0x58] sm:$0xff]   ;;  %v4682_v24 = vld [vmem:[%s4649_s23 + $0x60] sm:$0xff]  }
  0x13   : > { %v4673_v15 = vld [vmem:[%s4649_s23 + $0x10] sm:$0xff]   ;;  %v386_v19 = vshll.u32 %v4667_v13, 16  ;;  %v390_v20 = vshrl.u32 %v4667_v13, 16  ;;  %v394_v21 = vshll.u32 %v4670_v14, 16  ;;  %v398_v22 = vshrl.u32 %v4670_v14, 16  ;;  %v4687_v28 = vld [vmem:[%s4649_s23 + $0x18] sm:$0xff]  }
  0x14   : > { %v307_v9 = vshrl.u32 %v4656_v6, 16  ;;  %v309_v10 = vshll.u32 %v4656_v6, 16  ;;  %v316_v18 = vrot.slane %v314_v11, 1  ;;  %v322_v23 = vshll.u32 %v4673_v15, 16  ;;  %v4700_v37 = vld [vmem:[%s4649_s23 + $0x68] sm:$0xff]   ;;  %v4704_v39 = vld [vmem:[%s4649_s23 + $0x20] sm:$0xff]  }
  0x15   : > { %v4684_v27 = vrot.slane %v386_v19, 1  ;;  %v396_v29 = vrot.slane %v394_v21, 1  ;;  %v402_v31 = vshll.u32 %v4682_v24, 16  ;;  %v326_v32 = vshrl.u32 %v4673_v15, 16  ;;  %v4709_v44 = vld [vmem:[%s4649_s23 + $0x70] sm:$0xff]   ;;  %v4721_v50 = vld [vmem:[%s4649_s23 + $0x28] sm:$0xff]  }
  0x16   : > { %v311_v17 = vrot.slane %v309_v10, 1  ;;  %v320_v26 = vor.u32 %v318_v12, %v316_v18  ;;  %v324_v30 = vrot.slane %v322_v23, 1  ;;  %v330_v36 = vshll.u32 %v4687_v28, 16  ;;  %v4736_v62 = vld [vmem:[%s4649_s23 + $0x78] sm:$0xff]   ;;  %v4746_v10 = vld [vmem:[%s4649_s23 + $0x30] sm:$0xff]   ;;  %v4749_v11 = vld [vmem:[%s4649_s23 + $0x80] sm:$0xff]  }
  0x17   : > { %v392_v35 = vor.u32 %v390_v20, %v4684_v27  ;;  %v406_v38 = vshrl.u32 %v4682_v24, 16  ;;  %v400_v40 = vor.u32 %v398_v22, %v396_v29  ;;  %v404_v42 = vrot.slane %v402_v31, 1  ;;  %v4758_v23 = vld [vmem:[%s4649_s23 + $0x38] sm:$0xff]  }
  0x18   : > { %v312_v25 = vor.u32 %v311_v17, %v307_v9  ;;  %v325_v41 = vsel %vm305_vm1, %v320_v26, %v324_v30  ;;  %v328_v43 = vor.u32 %v326_v32, %v324_v30  ;;  %v332_v47 = vrot.slane %v330_v36, 1  ;;  %v4763_v26 = vld [vmem:[%s4649_s23 + $0x88] sm:$0xff]  }
  0x19   : > { %v397_v46 = vsel %vm305_vm1, %v392_v35, %v396_v29  ;;  %v410_v48 = vshll.u32 %v4700_v37, 16  ;;  %v334_v49 = vshrl.u32 %v4687_v28, 16  ;;  %v405_v51 = vsel %vm305_vm1, %v400_v40, %v404_v42  ;;  %v4775_v40 = vld [vmem:[%s4649_s23 + $0x48] sm:$0xff]  }
  0x1a   : > { %v317_v34 = vsel %vm305_vm1, %v312_v25, %v316_v18  ;;  %4189 = vmatprep.mubr.msk.bf16.mxu1 %vm454_vm2, %v397_v46  ;;  %v408_v52 = vor.u32 %v406_v38, %v404_v42  ;;  %v338_v53 = vshll.u32 %v4704_v39, 16  ;;  %v414_v54 = vshrl.u32 %v4700_v37, 16  ;;  %v4772_v38 = vld [vmem:[%s4649_s23 + $0x40] sm:$0xff]  }
  0x1b   : > { %4169 = vmatprep.mubr.msk.bf16.mxu0 %vm454_vm2, %v317_v34  ;;  %4190 = vmatmul.mubr.msk.bf16.vlgmr.msra.gmra.mxu1 %vm454_vm2, %v405_v51  ;;  %v333_v55 = vsel %vm305_vm1, %v328_v43, %v332_v47  ;;  %v412_v56 = vrot.slane %v410_v48, 1  ;;  %v336_v57 = vor.u32 %v334_v49, %v332_v47  ;;  %v418_v58 = vshll.u32 %v4709_v44, 16  ;;  %v4548_v43 = vld [vmem:[%s4649_s23 + $0x90] ss:$0 sps:$4 sm:$0x11]  }
  0x1c   : > { %4170 = vmatmul.mubr.msk.bf16.vlgmr.msra.gmra.mxu0 %vm454_vm2, %v325_v41  ;;  %4206 = vmatpush3.bf16.msra.mxu1 %v727_v16  ;;  %v340_v59 = vrot.slane %v338_v53, 1  ;;  %v342_v60 = vshrl.u32 %v4704_v39, 16  ;;  %v346_v61 = vshll.u32 %v4721_v50, 16  ;;  %v422_v2 = vshrl.u32 %v4709_v44, 16 }
  0x1d   : > { %4244 = vmatpush3.bf16.msra.mxu0 %v1005_v8  ;;  %4173 = vmatprep.mubr.msk.bf16.mxu0 %vm454_vm2, %v333_v55  ;;  %v413_v63 = vsel %vm305_vm1, %v408_v52, %v412_v56  ;;  %v416_v0 = vor.u32 %v414_v54, %v412_v56  ;;  %v420_v1 = vrot.slane %v418_v58, 1  ;;  %v426_v9 = vshll.u32 %v4736_v62, 16 }
  0x1e   : > { %4516 = vmatprep.subr.msk.bf16.mxu0 %vm509_vm0, %v4694_v33  ;;  %4515 = vmatprep.subr.msk.bf16.mxu1 %vm509_vm0, %v4714_v45  ;;  %v341_v3 = vsel %vm305_vm1, %v336_v57, %v340_v59  ;;  %v344_v4 = vor.u32 %v342_v60, %v340_v59  ;;  %v348_v8 = vrot.slane %v346_v61, 1  ;;  %v350_v17 = vshrl.u32 %v4721_v50, 16 }
  0x1f   : > { %4193 = vmatprep.mubr.msk.bf16.mxu1 %vm454_vm2, %v413_v63  ;;  %v421_v12 = vsel %vm305_vm1, %v416_v0, %v420_v1  ;;  %v424_v16 = vor.u32 %v422_v2, %v420_v1  ;;  %v430_v18 = vshrl.u32 %v4736_v62, 16  ;;  %v428_v20 = vrot.slane %v426_v9, 1  ;;  %v906_v63 = vld [vmem:[%s4649_s23] sm:$0xe] }
  0x20   : > { %v349_v19 = vsel %vm305_vm1, %v344_v4, %v348_v8  ;;  %v354_v21 = vshll.u32 %v4746_v10, 16  ;;  %v434_v22 = vshll.u32 %v4749_v11, 16  ;;  %v358_v25 = vshrl.u32 %v4746_v10, 16 }
  0x21   : > { %v429_v29 = vsel %vm305_vm1, %v424_v16, %v428_v20  ;;  %v352_v30 = vor.u32 %v350_v17, %v348_v8  ;;  %v362_v34 = vshll.u32 %v4758_v23, 16  ;;  %v438_v35 = vshrl.u32 %v4749_v11, 16 }
  0x22   : > { %v356_v31 = vrot.slane %v354_v21, 1  ;;  %v436_v32 = vrot.slane %v434_v22, 1  ;;  %v442_v36 = vshll.u32 %v4763_v26, 16  ;;  %v432_v41 = vor.u32 %v430_v18, %v428_v20 }
  0x23   : > { %4194 = vmatmul.mubr.msk.bf16.gmra.mxu1 %vm454_vm2, %v421_v12  ;;  %v364_v46 = vrot.slane %v362_v34, 1  ;;  %v370_v49 = vshll.u32 %v4772_v38, 16  ;;  %v366_v52 = vshrl.u32 %v4758_v23, 16  ;;  %v374_v54 = vshrl.u32 %v4772_v38, 16 }
  0x24   : > { %4174 = vmatmul.mubr.msk.bf16.gmra.mxu0 %vm454_vm2, %v341_v3  ;;  %4197 = vmatprep.mubr.msk.bf16.mxu1 %vm454_vm2, %v429_v29  ;;  %v360_v42 = vor.u32 %v358_v25, %v356_v31  ;;  %v440_v47 = vor.u32 %v438_v35, %v436_v32  ;;  %v444_v48 = vrot.slane %v442_v36, 1  ;;  %v357_v51 = vsel %vm305_vm1, %v352_v30, %v356_v31 }
  0x25   : > { %4177 = vmatprep.mubr.msk.bf16.mxu0 %vm454_vm2, %v349_v19  ;;  %v378_v55 = vshll.u32 %v4775_v40, 16  ;;  %v437_v56 = vsel %vm305_vm1, %v432_v41, %v436_v32  ;;  %v446_v57 = vshrl.u32 %v4763_v26, 16  ;;  %v450_v58 = vshll.u32 %v4548_v43, 16 }
  0x26   : > { %v365_v53 = vsel %vm305_vm1, %v360_v42, %v364_v46  ;;  %v445_v59 = vsel %vm305_vm1, %v440_v47, %v444_v48  ;;  %v372_v60 = vrot.slane %v370_v49, 1  ;;  %v368_v61 = vor.u32 %v366_v52, %v364_v46  ;;  %v4874_v46 = vld [vmem:[%s4649_s23 + $0x10] sm:$0xff]   ;;  %v4879_v49 = vld [vmem:[%s4649_s23 + $0x18] sm:$0xff]  }
  0x27   : > { %v380_v1 = vrot.slane %v378_v55, 1  ;;  %v448_v2 = vor.u32 %v446_v57, %v444_v48  ;;  %v452_v3 = vrot.slane %v450_v58, 1  ;;  %v382_v8 = vshrl.u32 %v4775_v40, 16  ;;  %v4892_v55 = vld [vmem:[%s4649_s23 + $0x30] sm:$0xff]  }
  0x28   : > { %v376_v0 = vor.u32 %v374_v54, %v372_v60  ;;  %v373_v4 = vsel %vm305_vm1, %v368_v61, %v372_v60  ;;  %v3818_v12 = vcombine.low %v906_v63, %v4653_v5  ;;  %v946_v17 = vrot.slane %v4763_v26, 1  ;;  %v4907_v61 = vld [vmem:[%s4649_s23 + $0x38] sm:$0xff]  }
  0x29   : > { %v453_v16 = vsel %vm305_vm1, %v448_v2, %v452_v3  ;;  %v384_v18 = vor.u32 %v382_v8, %v380_v1  ;;  %v948_v19 = vrot.slane %v4548_v43, 1  ;;  %v914_v21 = vrot.slane %v4659_v7, 1  ;;  %v2106_v43 = vld [vmem:[%s4649_s23 + $0x8] sm:$0xc]  ;;  %v4917_v2 = vld [vmem:[%s4649_s23 + $0x40] sm:$0xff]  }
  0x2a   : > { %v381_v9 = vsel %vm305_vm1, %v376_v0, %v380_v1  ;;  %v913_v20 = vrot.slane %v3818_v12, 1  ;;  %v1444_v29 = vsel %vm509_vm0, %v4714_v45, 0  ;;  %v916_v30 = vrot.slane %v4673_v15, 1  ;;  %v4925_v8 = vld [vmem:[%s4649_s23 + $0x48] sm:$0xff]  }
  0x2b   : > { %4198 = vmatmul.mubr.msk.bf16.gmra.mxu1 %vm454_vm2, %v437_v56  ;;  %v4808_v5 = vsel %vm912_vm3, %v946_v17, %v948_v19  ;;  %v389_v22 = vsel %vm305_vm1, %v384_v18, %v4684_v27  ;;  %v918_v27 = vrot.slane %v4687_v28, 1  ;;  %v1891_v31 = vsel %vm509_vm0, %v4694_v33, 0 }
  0x2c   : > { %4178 = vmatmul.mubr.msk.bf16.gmra.mxu0 %vm454_vm2, %v357_v51  ;;  %4201 = vmatprep.mubr.msk.bf16.mxu1 %vm454_vm2, %v445_v59  ;;  %v915_v25 = vsel %vm912_vm3, %v913_v20, %v914_v21  ;;  %v917_v45 = vsel %vm912_vm3, %v914_v21, %v916_v30  ;;  %v922_v34 = vrot.slane %v4721_v50, 1  ;;  %v926_v36 = vrot.slane %v4758_v23, 1  ;;  %v4883_v51 = vld [vmem:[%s4649_s23 + $0x20] sm:$0xff]  }
  0x2d   : > { %4181 = vmatprep.mubr.msk.bf16.mxu0 %vm454_vm2, %v365_v53  ;;  %v919_v32 = vsel %vm912_vm3, %v916_v30, %v918_v27  ;;  %v928_v42 = vrot.slane %v4772_v38, 1  ;;  %v2114_v53 = vrot.slane %v4874_v46, 2  ;;  %v2116_v54 = vrot.slane %v4879_v49, 2  ;;  %v4955_v30 = vld [vmem:[%s4649_s23 + $0x58] sm:$0xff]  }
  0x2e   : > { %v2118_v57 = vrot.slane %v4883_v51, 2  ;;  %v932_v58 = vrot.slane %v4667_v13, 1  ;;  %v934_v59 = vrot.slane %v4670_v14, 1  ;;  %v2122_v1 = vrot.slane %v4892_v55, 2 }
  0x2f   : > { %v929_v48 = vsel %vm912_vm3, %v926_v36, %v928_v42  ;;  %v4902_v60 = vsel %vm2112_vm4, %v2114_v53, %v2116_v54  ;;  %v2128_v18 = vrot.slane %v4925_v8, 2  ;;  %v936_v20 = vrot.slane %v4682_v24, 1 }
  0x30   : > { %v4910_v63 = vsel %vm2112_vm4, %v2116_v54, %v2118_v57 }
  0x33   : > { %4202 = vmatmul.mubr.msk.bf16.gmra.mxu1 %vm454_vm2, %v453_v16  ;;  %v2126_v16 = vrot.slane %v4917_v2, 2 }
  0x34   : > { %4182 = vmatmul.mubr.msk.bf16.gmra.mxu0 %vm454_vm2, %v373_v4  ;;  %4207 = vmatprep.mubr.msk.bf16.mxu1 %vm454_vm2, %v4656_v6  ;;  %v4821_v6 = vld [vmem:[%s6046_s1 + $0xa] sm:$0x3]  ;;  %v2124_v4 = vrot.slane %v4907_v61, 2 }
  0x35   : > { %4185 = vmatprep.mubr.msk.bf16.mxu0 %vm454_vm2, %v381_v9  ;;  %v4943_v21 = vsel %vm2112_vm4, %v2126_v16, %v2128_v18 }
  0x36   : > { %v4932_v12 = vsel %vm2112_vm4, %v2122_v1, %v2124_v4  ;;  %v4938_v19 = vsel %vm2112_vm4, %v2124_v4, %v2126_v16 }
  0x3b   : > { %4208 = vmatmul.mubr.msk.bf16.vlgmr.msra.gmra.mxu1 %vm454_vm2, %v4659_v7  ;;  %v4837_v7 = vld [vmem:[%s6046_s1 + $0xc] sm:$0x3] }
  0x3c   : > { %4186 = vmatmul.mubr.msk.bf16.gmra.mxu0 %vm454_vm2, %v389_v22  ;;  %4282 = vmatpush3.bf16.msra.mxu1 %v1444_v29  ;;  %v938_v22 = vrot.slane %v4700_v37, 1  ;;  %v937_v29 = vsel %vm912_vm3, %v934_v59, %v936_v20 }
  0x3d   : > { %4245 = vmatprep.mubr.msk.bf16.mxu0 %vm454_vm2, %v915_v25  ;;  %4211 = vmatprep.mubr.msk.bf16.mxu1 %vm454_vm2, %v4673_v15  ;;  %v920_v15 = vrot.slane %v4704_v39, 1  ;;  %v4951_v25 = vld [vmem:[%s4649_s23 + $0x50] sm:$0xff]  }
  0x3e   : > { %4517 = vmatprep.subr.msk.bf16.mxu1 %vm509_vm0, %v4821_v6 }
  0x3f   : > { %v921_v33 = vsel %vm912_vm3, %v918_v27, %v920_v15  ;;  %v923_v35 = vsel %vm912_vm3, %v920_v15, %v922_v34  ;;  %v939_v27 = vsel %vm912_vm3, %v936_v20, %v938_v22  ;;  %v942_v15 = vrot.slane %v4736_v62, 1 }
  0x43   : > { %4212 = vmatmul.mubr.msk.bf16.gmra.mxu1 %vm454_vm2, %v4687_v28  ;;  %v924_v28 = vrot.slane %v4746_v10, 1 }
  0x44   : > { %4246 = vmatmul.mubr.msk.bf16.vlgmr.msra.gmra.mxu0 %vm454_vm2, %v917_v45  ;;  %4215 = vmatprep.mubr.msk.bf16.mxu1 %vm454_vm2, %v4704_v39  ;;  %v2130_v45 = vrot.slane %v4951_v25, 2 }
  0x45   : > { %4320 = vmatpush3.bf16.msra.mxu0 %v1891_v31  ;;  %4249 = vmatprep.mubr.msk.bf16.mxu0 %vm454_vm2, %v919_v32  ;;  %v925_v39 = vsel %vm912_vm3, %v922_v34, %v924_v28  ;;  %v927_v41 = vsel %vm912_vm3, %v924_v28, %v926_v36  ;;  %v1220_v34 = vld [vmem:[%s4649_s23 + $0x8] sm:$0xe] }
  0x46   : > { %4518 = vmatprep.subr.msk.bf16.mxu0 %vm509_vm0, %v4837_v7  ;;  %v4962_v31 = vsel %vm2112_vm4, %v2128_v18, %v2130_v45  ;;  %v4980_v28 = vld [vmem:[%s4649_s23 + $0x68] sm:$0xff]  }
  0x4b   : > { %4216 = vmatmul.mubr.msk.bf16.gmra.mxu1 %vm454_vm2, %v4721_v50  ;;  %v930_v50 = vrot.slane %v4775_v40, 1 }
  0x4c   : > { %4250 = vmatmul.mubr.msk.bf16.gmra.mxu0 %vm454_vm2, %v921_v33  ;;  %4219 = vmatprep.mubr.msk.bf16.mxu1 %vm454_vm2, %v4746_v10  ;;  %v4871_v10 = vld [vmem:[%s4649_s23 + $0xc] sm:$0xf]  ;;  %v4976_v33 = vld [vmem:[%s4649_s23 + $0x60] sm:$0xff]  }
  0x4d   : > { %4253 = vmatprep.mubr.msk.bf16.mxu0 %vm454_vm2, %v923_v35  ;;  %v3896_v47 = vcombine.low %v2106_v43, %v4871_v10 }
  0x4f   : > { %v2113_v52 = vrot.slane %v3896_v47, 2  ;;  %v1675_v47 = vshrl.u32 %v4874_v46, 16 }
  0x51   : > { %v4895_v56 = vsel %vm2112_vm4, %v2113_v52, %v2114_v53  ;;  %v1353_v52 = vrot.slane %v4874_v46, 1  ;;  %v5003_v53 = vld [vmem:[%s4649_s23 + $0x70] sm:$0xff]  }
  0x52   : > { %v2138_v4 = vrot.slane %v5003_v53, 2 }
  0x53   : > { %4220 = vmatmul.mubr.msk.bf16.gmra.mxu1 %vm454_vm2, %v4758_v23  ;;  %v931_v23 = vsel %vm912_vm3, %v928_v42, %v930_v50  ;;  %v944_v42 = vrot.slane %v4749_v11, 1 }
  0x54   : > { %4254 = vmatmul.mubr.msk.bf16.gmra.mxu0 %vm454_vm2, %v925_v39  ;;  %4223 = vmatprep.mubr.msk.bf16.mxu1 %vm454_vm2, %v4772_v38  ;;  %v4887_v38 = vld [vmem:[%s4649_s23 + $0x28] sm:$0xff]   ;;  %v2134_v39 = vrot.slane %v4976_v33, 2 }
  0x55   : > { %4257 = vmatprep.mubr.msk.bf16.mxu0 %vm454_vm2, %v927_v41  ;;  %v2120_v0 = vrot.slane %v4887_v38, 2  ;;  %v3838_v41 = vcombine.low %v1220_v34, %v4871_v10  ;;  %v945_v54 = vsel %vm912_vm3, %v942_v15, %v944_v42  ;;  %v5036_v34 = vld [vmem:[%s4649_s23 + $0x88] sm:$0xff]  }
  0x57   : > { %v4920_v3 = vsel %vm2112_vm4, %v2118_v57, %v2120_v0  ;;  %v4928_v9 = vsel %vm2112_vm4, %v2120_v0, %v2122_v1  ;;  %v1667_v43 = vshrl.u32 %v3838_v41, 16  ;;  %v1670_v10 = vshll.u32 %v3838_v41, 16 }
  0x58   : > { %v947_v57 = vsel %vm912_vm3, %v944_v42, %v946_v17  ;;  %v1677_v0 = vrot.slane %v1675_v47, 1  ;;  %v1684_v17 = vshrl.u32 %v4879_v49, 16  ;;  %v1705_v47 = vshll.u32 %v4887_v38, 16 }
  0x5b   : > { %4224 = vmatmul.mubr.msk.bf16.gmra.mxu1 %vm454_vm2, %v4775_v40  ;;  %v933_v40 = vsel %vm912_vm3, %v930_v50, %v932_v58 }
  0x5c   : > { %4258 = vmatmul.mubr.msk.bf16.gmra.mxu0 %vm454_vm2, %v929_v48  ;;  %4227 = vmatprep.mubr.msk.bf16.mxu1 %vm454_vm2, %v4667_v13  ;;  %v935_v13 = vsel %vm912_vm3, %v932_v58, %v934_v59  ;;  %v1678_v48 = vshll.u32 %v4874_v46, 16  ;;  %v5010_v58 = vld [vmem:[%s4649_s23 + $0x78] sm:$0xff]   ;;  %v1672_v59 = vrot.slane %v1670_v10, 2  ;;  %v1702_v10 = vshrl.u32 %v4887_v38, 16 }
  0x5d   : > { %4261 = vmatprep.mubr.msk.bf16.mxu0 %vm454_vm2, %v931_v23  ;;  %v1352_v23 = vrot.slane %v3838_v41, 1 }
  0x5e   : > { %v1680_v1 = vrot.slane %v1678_v48, 2 }
  0x5f   : > { %v1354_v46 = vsel %vm912_vm3, %v1352_v23, %v1353_v52  ;;  %v1711_v23 = vshrl.u32 %v4892_v55, 16 }
  0x60   : > { %v1681_v20 = vor.u32 %v1680_v1, %v1677_v0  ;;  %v2644_v0 = vsel %vm509_vm0, %v4837_v7, 0  ;;  %v1704_v1 = vrot.slane %v1702_v10, 1 }
  0x63   : > { %4228 = vmatmul.mubr.msk.bf16.gmra.mxu1 %vm454_vm2, %v4670_v14  ;;  %v2132_v14 = vrot.slane %v4955_v30, 2 }
  0x64   : > { %4262 = vmatmul.mubr.msk.bf16.gmra.mxu0 %vm454_vm2, %v933_v40  ;;  %4231 = vmatprep.mubr.msk.bf16.mxu1 %vm454_vm2, %v4682_v24  ;;  %v940_v24 = vrot.slane %v4709_v44, 1 }
  0x65   : > { %4265 = vmatprep.mubr.msk.bf16.mxu0 %vm454_vm2, %v935_v13  ;;  %v4967_v32 = vsel %vm2112_vm4, %v2130_v45, %v2132_v14  ;;  %v1687_v13 = vshll.u32 %v4879_v49, 16  ;;  %v1357_v45 = vrot.slane %v4883_v51, 1 }
  0x66   : > { %v941_v35 = vsel %vm912_vm3, %v938_v22, %v940_v24  ;;  %v943_v36 = vsel %vm912_vm3, %v940_v24, %v942_v15  ;;  %v1693_v22 = vshrl.u32 %v4883_v51, 16  ;;  %v1686_v24 = vrot.slane %v1684_v17, 1 }
  0x67   : > { %v1689_v15 = vrot.slane %v1687_v13, 2  ;;  %v1713_v17 = vrot.slane %v1711_v23, 1 }
  0x6b   : > { %4232 = vmatmul.mubr.msk.bf16.gmra.mxu1 %vm454_vm2, %v4700_v37  ;;  %v2136_v37 = vrot.slane %v4980_v28, 2 }
  0x6c   : > { %4266 = vmatmul.mubr.msk.bf16.gmra.mxu0 %vm454_vm2, %v937_v29  ;;  %4235 = vmatprep.mubr.msk.bf16.mxu1 %vm454_vm2, %v4709_v44  ;;  %v4988_v44 = vsel %vm2112_vm4, %v2132_v14, %v2134_v39  ;;  %v1696_v29 = vshll.u32 %v4883_v51, 16  ;;  %v5033_v14 = vld [vmem:[%s4649_s23 + $0x80] sm:$0xff]  }
  0x6d   : > { %4269 = vmatprep.mubr.msk.bf16.mxu0 %vm454_vm2, %v939_v27  ;;  %v4993_v50 = vsel %vm2112_vm4, %v2134_v39, %v2136_v37  ;;  %v5017_v40 = vsel %vm2112_vm4, %v2136_v37, %v2138_v4  ;;  %v1355_v27 = vrot.slane %v4879_v49, 1  ;;  %v2142_v39 = vrot.slane %v5033_v14, 2 }
  0x6e   : > { %v2144_v37 = vrot.slane %v5036_v34, 2  ;;  %v2205_v49 = vsel %vm509_vm0, %v4821_v6, 0 }
  0x6f   : > { %v1356_v41 = vsel %vm912_vm3, %v1353_v52, %v1355_v27  ;;  %v1358_v51 = vsel %vm912_vm3, %v1355_v27, %v1357_v45  ;;  %v1714_v52 = vshll.u32 %v4892_v55, 16  ;;  %v1720_v27 = vshrl.u32 %v4907_v61, 16 }
  0x70   : > { %v5059_v6 = vsel %vm2112_vm4, %v2142_v39, %v2144_v37 }
  0x73   : > { %4236 = vmatmul.mubr.msk.bf16.gmra.mxu1 %vm454_vm2, %v4736_v62  ;;  %v1669_v62 = vrot.slane %v1667_v43, 1  ;;  %v1690_v43 = vor.u32 %v1689_v15, %v1686_v24 }
  0x74   : > { %4270 = vmatmul.mubr.msk.bf16.gmra.mxu0 %vm454_vm2, %v941_v35  ;;  %4239 = vmatprep.mubr.msk.bf16.mxu1 %vm454_vm2, %v4749_v11  ;;  %v2140_v11 = vrot.slane %v5010_v58, 2  ;;  %v1695_v35 = vrot.slane %v1693_v22, 1 }
  0x75   : > { %4273 = vmatprep.mubr.msk.bf16.mxu0 %vm454_vm2, %v943_v36  ;;  %v1673_v18 = vor.u32 %v1672_v59, %v1669_v62  ;;  %v1698_v36 = vrot.slane %v1696_v29, 2  ;;  %v5068_v62 = vld [vmem:[%s4649_s23 + $0x90] sm:$0xff]   ;;  %v1691_v59 = vsel %vm1665_vm5, %v1681_v20, %v1690_v43 }
  0x76   : > { %v5023_v16 = vsel %vm2112_vm4, %v2138_v4, %v2140_v11  ;;  %v5048_v42 = vsel %vm2112_vm4, %v2140_v11, %v2142_v39  ;;  %v1707_v4 = vrot.slane %v1705_v47, 2  ;;  %v5076_v11 = vld [vmem:[%s4649_s23 + $0x98] ss:$0 sps:$4 sm:$0x33]   ;;  %v1365_v39 = vrot.slane %v4917_v2, 1 }
  0x77   : > { %v1699_v48 = vor.u32 %v1698_v36, %v1695_v35  ;;  %v1732_v35 = vshll.u32 %v4917_v2, 16  ;;  %v1363_v36 = vrot.slane %v4907_v61, 1 }
  0x78   : > { %v1708_v29 = vor.u32 %v1707_v4, %v1704_v1  ;;  %v5121_v1 = vld [vmem:[%s4649_s23 + $0x14] sm:$0xf]  ;;  %v3306_v4 = vld [vmem:[%s4649_s23 + $0x10] sm:$0x8] }
  0x79   : > { %v1734_v10 = vrot.slane %v1732_v35, 2  ;;  %v1366_v23 = vsel %vm912_vm3, %v1363_v36, %v1365_v39 }
  0x7b   : > { %4240 = vmatmul.mubr.msk.bf16.gmra.mxu1 %vm454_vm2, %v4763_v26  ;;  %v1682_v26 = vsel %vm1665_vm5, %v1673_v18, %v1681_v20  ;;  %v5084_v18 = vld [vmem:[%s6046_s1 + $0x10] sm:$0x3]  ;;  %v2148_v20 = vrot.slane %v5076_v11, 2 }
  0x7c   : > { %4274 = vmatmul.mubr.msk.bf16.gmra.mxu0 %vm454_vm2, %v945_v54  ;;  %4283 = vmatprep.mubr.msk.bf16.mxu1 %vm454_vm2, %v1354_v46  ;;  %v1359_v54 = vrot.slane %v4887_v38, 1  ;;  %v1700_v46 = vsel %vm1665_vm5, %v1690_v43, %v1699_v48  ;;  %v1716_v38 = vrot.slane %v1714_v52, 2 }
  0x7d   : > { %4277 = vmatprep.mubr.msk.bf16.mxu0 %vm454_vm2, %v947_v57  ;;  %v1361_v57 = vrot.slane %v4892_v55, 1  ;;  %v2146_v55 = vrot.slane %v5068_v62, 2 }
  0x7e   : > { %v1360_v13 = vsel %vm912_vm3, %v1357_v45, %v1359_v54  ;;  %v1723_v45 = vshll.u32 %v4907_v61, 16  ;;  %v1717_v15 = vor.u32 %v1716_v38, %v1713_v17 }
  0x7f   : > { %v1362_v7 = vsel %vm912_vm3, %v1359_v54, %v1361_v57  ;;  %v5090_v22 = vsel %vm2112_vm4, %v2144_v37, %v2146_v55  ;;  %v5096_v24 = vsel %vm2112_vm4, %v2146_v55, %v2148_v20  ;;  %v1722_v37 = vrot.slane %v1720_v27, 1  ;;  %v5126_v55 = vld [vmem:[%s4649_s23 + $0x18] sm:$0xff]   ;;  %v5131_v27 = vld [vmem:[%s4649_s23 + $0x20] sm:$0xff]  }
  0x80   : > { %v1364_v47 = vsel %vm912_vm3, %v1361_v57, %v1363_v36  ;;  %v1747_v54 = vshrl.u32 %v4951_v25, 16  ;;  %v1750_v57 = vshll.u32 %v4951_v25, 16  ;;  %v1756_v36 = vshrl.u32 %v4955_v30, 16 }
  0x83   : > { %4284 = vmatmul.mubr.msk.bf16.vlgmr.msra.gmra.mxu1 %vm454_vm2, %v1356_v41  ;;  %v1709_v41 = vsel %vm1665_vm5, %v1699_v48, %v1708_v29  ;;  %v1741_v48 = vshll.u32 %v4925_v8, 16 }
  0x84   : > { %4278 = vmatmul.mubr.msk.bf16.gmra.mxu0 %vm454_vm2, %v4808_v5  ;;  %v5056_v5 = vld [vmem:[%s6046_s1 + $0xe] sm:$0x3]  ;;  %4358 = vmatpush3.bf16.msra.mxu1 %v2205_v49  ;;  %v1725_v49 = vrot.slane %v1723_v45, 2  ;;  %v3314_v45 = vrot.slane %v5126_v55, 3 }
  0x85   : > { %4321 = vmatprep.mubr.msk.bf16.mxu0 %vm454_vm2, %v1682_v26  ;;  %4287 = vmatprep.mubr.msk.bf16.mxu1 %vm454_vm2, %v1358_v51  ;;  %v1729_v26 = vshrl.u32 %v4917_v2, 16  ;;  %v1718_v51 = vsel %vm1665_vm5, %v1708_v29, %v1717_v15  ;;  %v1738_v2 = vshrl.u32 %v4925_v8, 16  ;;  %v1743_v38 = vrot.slane %v1741_v48, 2 }
  0x86   : > { %4519 = vmatprep.subr.msk.bf16.mxu1 %vm509_vm0, %v5056_v5  ;;  %v1726_v61 = vor.u32 %v1725_v49, %v1722_v37  ;;  %v1752_v29 = vrot.slane %v1750_v57, 2  ;;  %v1765_v49 = vshrl.u32 %v4976_v33, 16 }
  0x87   : > { %v1731_v43 = vrot.slane %v1729_v26, 1  ;;  %v1740_v17 = vrot.slane %v1738_v2, 1  ;;  %v6049_v26 = vrot.slane %v5131_v27, 3 }
  0x89   : > { %v1735_v52 = vor.u32 %v1734_v10, %v1731_v43  ;;  %v1744_v35 = vor.u32 %v1743_v38, %v1740_v17  ;;  %v5150_v43 = vsel %vm3312_vm6, %v3314_v45, %v6049_v26  ;;  %v1371_v10 = vrot.slane %v4955_v30, 1 }
  0x8a   : > { %v1783_v17 = vshrl.u32 %v5003_v53, 16  ;;  %v1786_v38 = vshll.u32 %v5003_v53, 16 }
  0x8b   : > { %4288 = vmatmul.mubr.msk.bf16.gmra.mxu1 %vm454_vm2, %v1360_v13  ;;  %v3974_v13 = vcombine.low %v3306_v4, %v5121_v1  ;;  %v1736_v20 = vsel %vm1665_vm5, %v1726_v61, %v1735_v52 }
  0x8c   : > { %4322 = vmatmul.mubr.msk.bf16.vlgmr.msra.gmra.mxu0 %vm454_vm2, %v1691_v59  ;;  %4291 = vmatprep.mubr.msk.bf16.mxu1 %vm454_vm2, %v1362_v7  ;;  %v1367_v59 = vrot.slane %v4925_v8, 1  ;;  %v1749_v7 = vrot.slane %v1747_v54, 1  ;;  %v1767_v54 = vrot.slane %v1765_v49, 1  ;;  %v1804_v49 = vshll.u32 %v5033_v14, 16 }
  0x8d   : > { %4396 = vmatpush3.bf16.msra.mxu0 %v2644_v0  ;;  %4325 = vmatprep.mubr.msk.bf16.mxu0 %vm454_vm2, %v1700_v46  ;;  %v1369_v0 = vrot.slane %v4951_v25, 1  ;;  %v1727_v46 = vsel %vm1665_vm5, %v1717_v15, %v1726_v61  ;;  %v3313_v25 = vrot.slane %v3974_v13, 3  ;;  %v1758_v61 = vrot.slane %v1756_v36, 1 }
  0x8e   : > { %4520 = vmatprep.subr.msk.bf16.mxu0 %vm509_vm0, %v5084_v18  ;;  %v1368_v8 = vsel %vm912_vm3, %v1365_v39, %v1367_v59  ;;  %v1753_v39 = vor.u32 %v1752_v29, %v1749_v7  ;;  %v1377_v13 = vrot.slane %v5003_v53, 1  ;;  %v1795_v53 = vshll.u32 %v5010_v58, 16 }
  0x8f   : > { %v1370_v15 = vsel %vm912_vm3, %v1367_v59, %v1369_v0  ;;  %v5142_v37 = vsel %vm3312_vm6, %v3313_v25, %v3314_v45  ;;  %v1372_v59 = vsel %vm912_vm3, %v1369_v0, %v1371_v10  ;;  %v1375_v0 = vrot.slane %v4980_v28, 1 }
  0x90   : > { %v1754_v48 = vsel %vm1665_vm5, %v1744_v35, %v1753_v39  ;;  %v1785_v25 = vrot.slane %v1783_v17, 1  ;;  %v1788_v45 = vrot.slane %v1786_v38, 2  ;;  %v1385_v17 = vrot.slane %v5068_v62, 1 }
  0x93   : > { %4292 = vmatmul.mubr.msk.bf16.gmra.mxu1 %vm454_vm2, %v1364_v47  ;;  %v1373_v47 = vrot.slane %v4976_v33, 1 }
  0x94   : > { %4326 = vmatmul.mubr.msk.bf16.gmra.mxu0 %vm454_vm2, %v1709_v41  ;;  %4295 = vmatprep.mubr.msk.bf16.mxu1 %vm454_vm2, %v1366_v23  ;;  %v1759_v41 = vshll.u32 %v4955_v30, 16  ;;  %v1745_v23 = vsel %vm1665_vm5, %v1735_v52, %v1744_v35  ;;  %v1774_v30 = vshrl.u32 %v4980_v28, 16  ;;  %v1378_v35 = vsel %vm912_vm3, %v1375_v0, %v1377_v13 }
  0x95   : > { %4329 = vmatprep.mubr.msk.bf16.mxu0 %vm454_vm2, %v1718_v51  ;;  %v1768_v51 = vshll.u32 %v4976_v33, 16  ;;  %v1374_v4 = vsel %vm912_vm3, %v1371_v10, %v1373_v47  ;;  %v1777_v33 = vshll.u32 %v4980_v28, 16  ;;  %v1792_v28 = vshrl.u32 %v5010_v58, 16 }
  0x96   : > { %v1761_v2 = vrot.slane %v1759_v41, 2  ;;  %v1776_v7 = vrot.slane %v1774_v30, 1  ;;  %v1789_v41 = vor.u32 %v1788_v45, %v1785_v25  ;;  %v1381_v10 = vrot.slane %v5033_v14, 1  ;;  %v4569_v25 = vld [vmem:[%s4649_s23 + $0x98] ss:$0 sps:$4 sm:$0x11]  }
  0x97   : > { %v1770_v57 = vrot.slane %v1768_v51, 2  ;;  %v1779_v29 = vrot.slane %v1777_v33, 2  ;;  %v1379_v51 = vrot.slane %v5010_v58, 1  ;;  %v1810_v58 = vshrl.u32 %v5036_v34, 16 }
  0x98   : > { %v1819_v30 = vshrl.u32 %v5068_v62, 16  ;;  %v1822_v33 = vshll.u32 %v5068_v62, 16  ;;  %v1828_v62 = vshrl.u32 %v5076_v11, 16 }
  0x99   : > { %v1771_v52 = vor.u32 %v1770_v57, %v1767_v54  ;;  %v1780_v36 = vor.u32 %v1779_v29, %v1776_v7  ;;  %v1806_v54 = vrot.slane %v1804_v49, 2  ;;  %v1380_v57 = vsel %vm912_vm3, %v1377_v13, %v1379_v51 }
  0x9a   : > { %v1821_v7 = vrot.slane %v1819_v30, 1  ;;  %v1824_v29 = vrot.slane %v1822_v33, 2  ;;  %v5261_v30 = vld [vmem:[%s4649_s23 + $0x48] sm:$0xff]  }
  0x9b   : > { %4296 = vmatmul.mubr.msk.bf16.gmra.mxu1 %vm454_vm2, %v1368_v8 }
  0x9c   : > { %4330 = vmatmul.mubr.msk.bf16.gmra.mxu0 %vm454_vm2, %v1727_v46  ;;  %4299 = vmatprep.mubr.msk.bf16.mxu1 %vm454_vm2, %v1370_v15  ;;  %v1762_v46 = vor.u32 %v1761_v2, %v1758_v61  ;;  %v1376_v15 = vsel %vm912_vm3, %v1373_v47, %v1375_v0  ;;  %v1781_v47 = vsel %vm1665_vm5, %v1771_v52, %v1780_v36  ;;  %v1797_v61 = vrot.slane %v1795_v53, 2 }
  0x9d   : > { %4333 = vmatprep.mubr.msk.bf16.mxu0 %vm454_vm2, %v1736_v20  ;;  %v1790_v2 = vsel %vm1665_vm5, %v1780_v36, %v1789_v41  ;;  %v1812_v0 = vrot.slane %v1810_v58, 1  ;;  %v1387_v36 = vrot.slane %v4569_v25, 1  ;;  %v5245_v58 = vld [vmem:[%s4649_s23 + $0x38] sm:$0xff]  }
  0x9e   : > { %v1763_v20 = vsel %vm1665_vm5, %v1753_v39, %v1762_v46  ;;  %v1772_v8 = vsel %vm1665_vm5, %v1762_v46, %v1771_v52  ;;  %v1801_v39 = vshrl.u32 %v5033_v14, 16  ;;  %v1813_v14 = vshll.u32 %v5036_v34, 16 }
  0x9f   : > { %v1383_v52 = vrot.slane %v5036_v34, 1 }
  0xa0   : > { %v1815_v13 = vrot.slane %v1813_v14, 2  ;;  %v5257_v14 = vld [vmem:[%s4649_s23 + $0x40] sm:$0xff]  }
  0xa1   : > { %v1386_v45 = vsel %vm912_vm3, %v1383_v52, %v1385_v17 }
  0xa2   : > { %v1816_v34 = vor.u32 %v1815_v13, %v1812_v0 }
  0xa3   : > { %4300 = vmatmul.mubr.msk.bf16.gmra.mxu1 %vm454_vm2, %v1372_v59  ;;  %v1382_v59 = vsel %vm912_vm3, %v1379_v51, %v1381_v10 }
  0xa4   : > { %4334 = vmatmul.mubr.msk.bf16.gmra.mxu0 %vm454_vm2, %v1745_v23  ;;  %4303 = vmatprep.mubr.msk.bf16.mxu1 %vm454_vm2, %v1374_v4  ;;  %v1794_v23 = vrot.slane %v1792_v28, 1  ;;  %v2420_v28 = vld [vmem:[%s4649_s23 + $0x10] sm:$0xc] }
  0xa5   : > { %4337 = vmatprep.mubr.msk.bf16.mxu0 %vm454_vm2, %v1754_v48  ;;  %v1803_v48 = vrot.slane %v1801_v39, 1  ;;  %v5212_v51 = vcombine.low %v2420_v28, %v5121_v1 }
  0xa6   : > { %v1798_v4 = vor.u32 %v1797_v61, %v1794_v23  ;;  %v2553_v23 = vrot.slane %v5126_v55, 2 }
  0xa7   : > { %v1807_v46 = vor.u32 %v1806_v54, %v1803_v48  ;;  %v3091_v48 = vsel %vm509_vm0, %v5056_v5, 0  ;;  %v2555_v54 = vrot.slane %v5131_v27, 2  ;;  %v3405_v5 = vsel %vm509_vm0, %v5084_v18, 0 }
  0xa8   : > { %v1799_v38 = vsel %vm1665_vm5, %v1789_v41, %v1798_v4  ;;  %v1830_v41 = vrot.slane %v1828_v62, 1 }
  0xa9   : > { %v1817_v53 = vsel %vm1665_vm5, %v1807_v46, %v1816_v34 }
  0xab   : > { %4304 = vmatmul.mubr.msk.bf16.gmra.mxu1 %vm454_vm2, %v1376_v15  ;;  %v1831_v15 = vshll.u32 %v5076_v11, 16 }
  0xac   : > { %4338 = vmatmul.mubr.msk.bf16.gmra.mxu0 %vm454_vm2, %v1763_v20  ;;  %4307 = vmatprep.mubr.msk.bf16.mxu1 %vm454_vm2, %v1378_v35  ;;  %v1808_v20 = vsel %vm1665_vm5, %v1798_v4, %v1807_v46  ;;  %v1825_v35 = vor.u32 %v1824_v29, %v1821_v7 }
  0xad   : > { %4341 = vmatprep.mubr.msk.bf16.mxu0 %vm454_vm2, %v1772_v8  ;;  %v1384_v8 = vsel %vm912_vm3, %v1381_v10, %v1383_v52  ;;  %v1833_v39 = vrot.slane %v1831_v15, 2  ;;  %v1388_v10 = vsel %vm912_vm3, %v1385_v17, %v1387_v36  ;;  %v2565_v17 = vrot.slane %v5261_v30, 2 }
  0xae   : > { %v1826_v49 = vsel %vm1665_vm5, %v1816_v34, %v1825_v35 }
  0xaf   : > { %v1834_v11 = vor.u32 %v1833_v39, %v1830_v41 }
  0xb1   : > { %v1835_v1 = vsel %vm1665_vm5, %v1825_v35, %v1834_v11 }
  0xb3   : > { %4308 = vmatmul.mubr.msk.bf16.gmra.mxu1 %vm454_vm2, %v1380_v57  ;;  %v2556_v57 = vsel %vm2112_vm4, %v2553_v23, %v2555_v54 }
  0xb4   : > { %4342 = vmatmul.mubr.msk.bf16.gmra.mxu0 %vm454_vm2, %v1781_v47  ;;  %4311 = vmatprep.mubr.msk.bf16.mxu1 %vm454_vm2, %v1382_v59  ;;  %v2552_v47 = vrot.slane %v5212_v51, 2  ;;  %v5239_v59 = vld [vmem:[%s4649_s23 + $0x30] sm:$0xff]  }
  0xb5   : > { %4345 = vmatprep.mubr.msk.bf16.mxu0 %vm454_vm2, %v1790_v2  ;;  %v5225_v2 = vld [vmem:[%s4649_s23 + $0x28] sm:$0xff]  }
  0xb6   : > { %v2554_v61 = vsel %vm2112_vm4, %v2552_v47, %v2553_v23 }
  0xbb   : > { %4312 = vmatmul.mubr.msk.bf16.gmra.mxu1 %vm454_vm2, %v1384_v8  ;;  %v5291_v8 = vld [vmem:[%s4649_s23 + $0x58] sm:$0xff]  }
  0xbc   : > { %4346 = vmatmul.mubr.msk.bf16.gmra.mxu0 %vm454_vm2, %v1799_v38  ;;  %4315 = vmatprep.mubr.msk.bf16.mxu1 %vm454_vm2, %v1386_v45  ;;  %v2569_v15 = vrot.slane %v5291_v8, 2 }
  0xbd   : > { %4349 = vmatprep.mubr.msk.bf16.mxu0 %vm454_vm2, %v1808_v20  ;;  %v5283_v20 = vld [vmem:[%s4649_s23 + $0x50] sm:$0xff]  }
  0xbe   : > { %v2567_v45 = vrot.slane %v5283_v20, 2 }
  0xc0   : > { %v2568_v28 = vsel %vm2112_vm4, %v2565_v17, %v2567_v45 }
  0xc3   : > { %4316 = vmatmul.mubr.msk.bf16.gmra.mxu1 %vm454_vm2, %v1388_v10 }
  0xc4   : > { %4350 = vmatmul.mubr.msk.bf16.gmra.mxu0 %vm454_vm2, %v1817_v53  ;;  %4359 = vmatprep.mubr.msk.bf16.mxu1 %vm454_vm2, %v4895_v56  ;;  %v2557_v56 = vrot.slane %v5225_v2, 2  ;;  %v5315_v53 = vld [vmem:[%s4649_s23 + $0x60] sm:$0xff]  }
  0xc5   : > { %4353 = vmatprep.mubr.msk.bf16.mxu0 %vm454_vm2, %v1826_v49  ;;  %v5323_v49 = vld [vmem:[%s4649_s23 + $0x68] sm:$0xff]   ;;  %v2571_v11 = vrot.slane %v5315_v53, 2 }
  0xc6   : > { %v2558_v4 = vsel %vm2112_vm4, %v2555_v54, %v2557_v56 }
  0xc7   : > { %v2572_v54 = vsel %vm2112_vm4, %v2569_v15, %v2571_v11 }
  0xcb   : > { %4360 = vmatmul.mubr.msk.bf16.vlgmr.msra.gmra.mxu1 %vm454_vm2, %v4902_v60  ;;  %v2559_v60 = vrot.slane %v5239_v59, 2 }
  0xcc   : > { %4354 = vmatmul.mubr.msk.bf16.gmra.mxu0 %vm454_vm2, %v1835_v1  ;;  %4434 = vmatpush3.bf16.msra.mxu1 %v3091_v48  ;;  %v2573_v1 = vrot.slane %v5323_v49, 2 }
  0xcd   : > { %4397 = vmatprep.mubr.msk.bf16.mxu0 %vm454_vm2, %v2554_v61  ;;  %4363 = vmatprep.mubr.msk.bf16.mxu1 %vm454_vm2, %v4910_v63  ;;  %v2561_v63 = vrot.slane %v5245_v58, 2  ;;  %v2560_v18 = vsel %vm2112_vm4, %v2557_v56, %v2559_v60  ;;  %v5347_v56 = vld [vmem:[%s4649_s23 + $0x70] sm:$0xff]  }
  0xcf   : > { %v2562_v46 = vsel %vm2112_vm4, %v2559_v60, %v2561_v63 }
  0xd3   : > { %4364 = vmatmul.mubr.msk.bf16.gmra.mxu1 %vm454_vm2, %v4920_v3  ;;  %v2563_v3 = vrot.slane %v5257_v14, 2 }
  0xd4   : > { %4398 = vmatmul.mubr.msk.bf16.vlgmr.msra.gmra.mxu0 %vm454_vm2, %v2556_v57  ;;  %4367 = vmatprep.mubr.msk.bf16.mxu1 %vm454_vm2, %v4928_v9 }
  0xd5   : > { %4472 = vmatpush3.bf16.msra.mxu0 %v3405_v5  ;;  %4401 = vmatprep.mubr.msk.bf16.mxu0 %vm454_vm2, %v2558_v4  ;;  %v2564_v13 = vsel %vm2112_vm4, %v2561_v63, %v2563_v3  ;;  %v5355_v4 = vld [vmem:[%s4649_s23 + $0x78] sm:$0xff]   ;;  %v2575_v63 = vrot.slane %v5347_v56, 2 }
  0xdb   : > { %v5268_v52 = vpop.f32.mrf.mxu1  ;;  %4368 = vmatmul.mubr.msk.bf16.gmra.mxu1 %vm454_vm2, %v4932_v12  ;;  %v2566_v12 = vsel %vm2112_vm4, %v2563_v3, %v2565_v17  ;;  %v2577_v3 = vrot.slane %v5355_v4, 2 }
  0xdc   : > { %v5263_v33 = vpop.f32.mrf.mxu0  ;;  %4402 = vmatmul.mubr.msk.bf16.gmra.mxu0 %vm454_vm2, %v2560_v18  ;;  %4371 = vmatprep.mubr.msk.bf16.mxu1 %vm454_vm2, %v4938_v19 }
  0xdd   : > { %4405 = vmatprep.mubr.msk.bf16.mxu0 %vm454_vm2, %v2562_v46  ;;  %v5277_v38 = vpop.f32.mrf.mxu1 }
  0xde   : > { %v5272_v9 = vpop.f32.mrf.mxu0 }
  0xdf   : > { %v5285_v7 = vpop.f32.mrf.mxu1 }
  0xe0   : > { %v5279_v0 = vpop.f32.mrf.mxu0 }
  0xe1   : > { %v5293_v25 = vpop.f32.mrf.mxu1 }
  0xe2   : > { %v5287_v29 = vpop.f32.mrf.mxu0 }
  0xe3   : > { %v5300_v34 = vpop.f32.mrf.mxu1  ;;  %4372 = vmatmul.mubr.msk.bf16.gmra.mxu1 %vm454_vm2, %v4943_v21  ;;  %v2570_v21 = vsel %vm2112_vm4, %v2567_v45, %v2569_v15  ;;  %v5379_v45 = vld [vmem:[%s4649_s23 + $0x80] sm:$0xff]  }
  0xe4   : > { %v5295_v19 = vpop.f32.mrf.mxu0  ;;  %4406 = vmatmul.mubr.msk.bf16.gmra.mxu0 %vm454_vm2, %v2564_v13  ;;  %4375 = vmatprep.mubr.msk.bf16.mxu1 %vm454_vm2, %v4962_v31  ;;  %6064 = vst [vmem:[#allocation10_spill] sm:$0xff] %v5379_v45 }
  0xe5   : > { %4409 = vmatprep.mubr.msk.bf16.mxu0 %vm454_vm2, %v2566_v12  ;;  %v5309_v35 = vpop.f32.mrf.mxu1  ;;  %v2576_v12 = vsel %vm2112_vm4, %v2573_v1, %v2575_v63 }
  0xe6   : > { %v5304_v62 = vpop.f32.mrf.mxu0 }
  0xe7   : > { %v5317_v41 = vpop.f32.mrf.mxu1 }
  0xe8   : > { %v5311_v36 = vpop.f32.mrf.mxu0  ;;  %6056 = vst [vmem:[#allocation2_spill] sm:$0xff] %v5317_v41 }
  0xe9   : > { %v5325_v10 = vpop.f32.mrf.mxu1 }
  0xea   : > { %v5319_v39 = vpop.f32.mrf.mxu0  ;;  %6057 = vst [vmem:[#allocation3_spill] sm:$0xff] %v5325_v10 }
  0xeb   : > { %v5332_v47 = vpop.f32.mrf.mxu1  ;;  %4376 = vmatmul.mubr.msk.bf16.gmra.mxu1 %vm454_vm2, %v4967_v32  ;;  %v2574_v32 = vsel %vm2112_vm4, %v2571_v11, %v2573_v1 }
  0xec   : > { %v5327_v31 = vpop.f32.mrf.mxu0  ;;  %4410 = vmatmul.mubr.msk.bf16.gmra.mxu0 %vm454_vm2, %v2568_v28  ;;  %6058 = vst [vmem:[#allocation4_spill] sm:$0xff] %v5332_v47  ;;  %4379 = vmatprep.mubr.msk.bf16.mxu1 %vm454_vm2, %v4988_v44 }
  0xed   : > { %4413 = vmatprep.mubr.msk.bf16.mxu0 %vm454_vm2, %v2570_v21  ;;  %v5341_v61 = vpop.f32.mrf.mxu1  ;;  %v5387_v21 = vld [vmem:[%s4649_s23 + $0x88] sm:$0xff]  }
  0xee   : > { %v5336_v23 = vpop.f32.mrf.mxu0  ;;  %6059 = vst [vmem:[#allocation5_spill] sm:$0xff] %v5341_v61  ;;  %6066 = vst [vmem:[#allocation12_spill] sm:$0xff] %v5387_v21  ;;  %v5419_v61 = vld [vmem:[%s4649_s23 + $0x98] sm:$0xff]  }
  0xef   : > { %v5349_v57 = vpop.f32.mrf.mxu1  ;;  %6068 = vst [vmem:[#allocation14_spill] sm:$0xff] %v5419_v61 }
  0xf0   : > { %v5343_v48 = vpop.f32.mrf.mxu0  ;;  %6060 = vst [vmem:[#allocation6_spill] sm:$0xff] %v5349_v57  ;;  %v5413_v57 = vld [vmem:[%s4649_s23 + $0x90] sm:$0xff]  }
  0xf1   : > { %v5357_v60 = vpop.f32.mrf.mxu1 }
  0xf2   : > { %v5351_v5 = vpop.f32.mrf.mxu0  ;;  %6061 = vst [vmem:[#allocation7_spill] sm:$0xff] %v5357_v60 }
  0xf3   : > { %v5364_v18 = vpop.f32.mrf.mxu1  ;;  %4380 = vmatmul.mubr.msk.bf16.gmra.mxu1 %vm454_vm2, %v4993_v50  ;;  %v2578_v50 = vsel %vm2112_vm4, %v2575_v63, %v2577_v3  ;;  %v2581_v63 = vrot.slane %v5387_v21, 2 }
  0xf4   : > { %v5359_v44 = vpop.f32.mrf.mxu0  ;;  %4414 = vmatmul.mubr.msk.bf16.gmra.mxu0 %vm454_vm2, %v2572_v54  ;;  %6062 = vst [vmem:[#allocation8_spill] sm:$0xff] %v5364_v18  ;;  %4383 = vmatprep.mubr.msk.bf16.mxu1 %vm454_vm2, %v5017_v40  ;;  %v2579_v40 = vrot.slane %v5379_v45, 2 }
  0xf5   : > { %4417 = vmatprep.mubr.msk.bf16.mxu0 %vm454_vm2, %v2574_v32  ;;  %v5373_v17 = vpop.f32.mrf.mxu1 }
  0xf6   : > { %v5368_v46 = vpop.f32.mrf.mxu0  ;;  %6063 = vst [vmem:[#allocation9_spill] sm:$0xff] %v5373_v17  ;;  %v2875_v17 = vshrl.u32 %v5126_v55, 16  ;;  %v2580_v60 = vsel %vm2112_vm4, %v2577_v3, %v2579_v40 }
  0xf7   : > { %v5381_v15 = vpop.f32.mrf.mxu1 }
  0xf8   : > { %v5375_v13 = vpop.f32.mrf.mxu0  ;;  %6065 = vst [vmem:[#allocation11_spill] sm:$0xff] %v5381_v15  ;;  %v2870_v15 = vshll.u32 %v5212_v51, 16 }
  0xf9   : > { %v5389_v11 = vpop.f32.mrf.mxu1 }
  0xfa   : > { %v5383_v28 = vpop.f32.mrf.mxu0  ;;  %6067 = vst [vmem:[#allocation13_spill] sm:$0xff] %v5389_v11  ;;  %v2872_v21 = vrot.slane %v2870_v15, 3 }
  0xfb   : > { %v4209_v1 = vpop.f32.mrf.mxu1  ;;  %4384 = vmatmul.mubr.msk.bf16.gmra.mxu1 %vm454_vm2, %v5023_v16  ;;  %v2878_v16 = vshll.u32 %v5126_v55, 16 }
  0xfc   : > { %v5391_v54 = vpop.f32.mrf.mxu0  ;;  %4418 = vmatmul.mubr.msk.bf16.gmra.mxu0 %vm454_vm2, %v2576_v12  ;;  %v772_v26 = vadd.f32 %v4209_v1, %v5263_v33  ;;  %4387 = vmatprep.mubr.msk.bf16.mxu1 %vm454_vm2, %v5048_v42  ;;  %v2582_v42 = vsel %vm2112_vm4, %v2579_v40, %v2581_v63  ;;  %v2583_v40 = vrot.slane %v5413_v57, 2 }
  0xfd   : > { %4421 = vmatprep.mubr.msk.bf16.mxu0 %vm454_vm2, %v2578_v50  ;;  %v763_v12 = vpop.f32.mrf.mxu1  ;;  %v2867_v50 = vshrl.u32 %v5212_v51, 16 }
  0xfe   : > { %v5398_v32 = vpop.f32.mrf.mxu0  ;;  %v764_v18 = vadd.f32 %v763_v12, %v5272_v9  ;;  %v2877_v9 = vrot.slane %v2875_v17, 2  ;;  %v2880_v12 = vrot.slane %v2878_v16, 3 }
  0xff   : > { %v4210_v33 = vpop.f32.mrf.mxu1  ;;  %v2869_v55 = vrot.slane %v2867_v50, 2 }
 0x100   : > { %v5404_v11 = vpop.f32.mrf.mxu0  ;;  %v775_v47 = vadd.f32 %v4210_v33, %v5279_v0  ;;  %v2585_v33 = vrot.slane %v5419_v61, 2  ;;  %v2881_v16 = vor.u32 %v2880_v12, %v2877_v9 }
 0x101   : > { %v766_v51 = vpop.f32.mrf.mxu1  ;;  %v2873_v50 = vor.u32 %v2872_v21, %v2869_v55 }
 0x102   : > { %v5415_v1 = vpop.f32.mrf.mxu0  ;;  %v767_v3 = vadd.f32 %v766_v51, %v5287_v29  ;;  %v2887_v29 = vshll.u32 %v5131_v27, 16 }
 0x103   : > { %v4213_v41 = vpop.f32.mrf.mxu1  ;;  %4388 = vmatmul.mubr.msk.bf16.gmra.mxu1 %vm454_vm2, %v5059_v6  ;;  %v2893_v6 = vshrl.u32 %v5225_v2, 16 }
 0x104   : > { %v4247_v10 = vpop.f32.mrf.mxu0  ;;  %4422 = vmatmul.mubr.msk.bf16.gmra.mxu0 %vm454_vm2, %v2580_v60  ;;  %v788_v60 = vadd.f32 %v4213_v41, %v5295_v19  ;;  %4391 = vmatprep.mubr.msk.bf16.mxu1 %vm454_vm2, %v5090_v22  ;;  %v2584_v41 = vsel %vm2112_vm4, %v2581_v63, %v2583_v40  ;;  %v4590_v22 = vld [vmem:[%s4649_s23 + $0xa0] ss:$0 sps:$4 sm:$0x33]   ;;  %v2889_v9 = vrot.slane %v2887_v29, 3  ;;  %v2905_v29 = vshll.u32 %v5239_v59, 16 }
 0x105   : > { %v5424_v45 = vadd.f32 %v4247_v10, %v772_v26  ;;  %4425 = vmatprep.mubr.msk.bf16.mxu0 %vm454_vm2, %v2582_v42  ;;  %v2884_v26 = vshrl.u32 %v5131_v27, 16  ;;  %v779_v10 = vpop.f32.mrf.mxu1  ;;  %v2896_v42 = vshll.u32 %v5225_v2, 16 }
 0x106   : > { %v1041_v0 = vpop.f32.mrf.mxu0  ;;  %v780_v51 = vadd.f32 %v779_v10, %v5304_v62  ;;  %v2882_v62 = vsel %vm2865_vm7, %v2873_v50, %v2881_v16 }
 0x107   : > { %6069 = vst [vmem:[#allocation15_spill] sm:$0xff] %v5424_v45  ;;  %v5432_v17 = vadd.f32 %v1041_v0, %v764_v18  ;;  %v4214_v18 = vpop.f32.mrf.mxu1  ;;  %v2886_v55 = vrot.slane %v2884_v26, 2  ;;  %v2898_v63 = vrot.slane %v2896_v42, 3  ;;  %v2902_v26 = vshrl.u32 %v5239_v59, 16 }
 0x108   : > { %v4248_v15 = vpop.f32.mrf.mxu0  ;;  %v791_v45 = vadd.f32 %v4214_v18, %v5311_v36  ;;  %v2911_v42 = vshrl.u32 %v5245_v58, 16 }
 0x109   : > { %6070 = vst [vmem:[#allocation16_spill] sm:$0xff] %v5432_v17  ;;  %v5441_v19 = vadd.f32 %v4248_v15, %v775_v47  ;;  %v2586_v17 = vsel %vm2112_vm4, %v2583_v40, %v2585_v33  ;;  %v782_v12 = vpop.f32.mrf.mxu1  ;;  %v2895_v47 = vrot.slane %v2893_v6, 2  ;;  %v2587_v40 = vrot.slane %v4590_v22, 2 }
 0x10a   : > { %v1044_v0 = vpop.f32.mrf.mxu0  ;;  %v783_v10 = vadd.f32 %v782_v12, %v5319_v39  ;;  %v2890_v39 = vor.u32 %v2889_v9, %v2886_v55  ;;  %v2907_v12 = vrot.slane %v2905_v29, 3 }
 0x10b   : > { %v5447_v21 = vadd.f32 %v1044_v0, %v767_v3  ;;  %v4217_v36 = vpop.f32.mrf.mxu1  ;;  %4392 = vmatmul.mubr.msk.bf16.gmra.mxu1 %vm454_vm2, %v5096_v24  ;;  %v2588_v18 = vsel %vm2112_vm4, %v2585_v33, %v2587_v40 }
 0x10c   : > { %v4251_v61 = vpop.f32.mrf.mxu0  ;;  %4426 = vmatmul.mubr.msk.bf16.gmra.mxu0 %vm454_vm2, %v2584_v41  ;;  %v804_v50 = vadd.f32 %v4217_v36, %v5327_v31  ;;  %4435 = vmatprep.mubr.msk.bf16.mxu1 %vm454_vm2, %v2882_v62  ;;  %v2914_v41 = vshll.u32 %v5245_v58, 16  ;;  %v2891_v9 = vsel %vm2865_vm7, %v2881_v16, %v2890_v39 }
 0x10d   : > { %v5452_v15 = vadd.f32 %v4251_v61, %v788_v60  ;;  %4429 = vmatprep.mubr.msk.bf16.mxu0 %vm454_vm2, %v2586_v17  ;;  %v795_v61 = vpop.f32.mrf.mxu1  ;;  %v2899_v17 = vor.u32 %v2898_v63, %v2895_v47 }
 0x10e   : > { %v1057_v3 = vpop.f32.mrf.mxu0  ;;  %v796_v24 = vadd.f32 %v795_v61, %v5336_v23  ;;  %v2916_v36 = vrot.slane %v2914_v41, 3 }
 0x10f   : > { %v5460_v6 = vadd.f32 %v1057_v3, %v780_v51  ;;  %v4218_v0 = vpop.f32.mrf.mxu1  ;;  %v2904_v51 = vrot.slane %v2902_v26, 2  ;;  %v2900_v23 = vsel %vm2865_vm7, %v2890_v39, %v2899_v17  ;;  %v3318_v3 = vrot.slane %v5225_v2, 3 }
 0x110   : > { %v4252_v60 = vpop.f32.mrf.mxu0  ;;  %v807_v62 = vadd.f32 %v4218_v0, %v5343_v48  ;;  %v6071_v0 = vrot.slane %v5131_v27, 3 }
 0x111   : > { %v5466_v22 = vadd.f32 %v4252_v60, %v791_v45  ;;  %v798_v47 = vpop.f32.mrf.mxu1  ;;  %v2913_v45 = vrot.slane %v2911_v42, 2  ;;  %v2908_v16 = vor.u32 %v2907_v12, %v2904_v51  ;;  %v2929_v60 = vshrl.u32 %v5261_v30, 16 }
 0x112   : > { %v1060_v31 = vpop.f32.mrf.mxu0  ;;  %v799_v33 = vadd.f32 %v798_v47, %v5351_v5  ;;  %v2920_v5 = vshrl.u32 %v5257_v14, 16  ;;  %v2932_v42 = vshll.u32 %v5261_v30, 16 }
 0x113   : > { %v5470_v55 = vadd.f32 %v1060_v31, %v783_v10  ;;  %v4221_v48 = vpop.f32.mrf.mxu1  ;;  %4436 = vmatmul.mubr.msk.bf16.vlgmr.msra.gmra.mxu1 %vm454_vm2, %v2891_v9  ;;  %v3319_v31 = vsel %vm3312_vm6, %v6071_v0, %v3318_v3 }
 0x114   : > { %v4255_v63 = vpop.f32.mrf.mxu0  ;;  %4430 = vmatmul.mubr.msk.bf16.gmra.mxu0 %vm454_vm2, %v2588_v18  ;;  %v820_v26 = vadd.f32 %v4221_v48, %v5359_v44  ;;  %4439 = vmatprep.mubr.msk.bf16.mxu1 %vm454_vm2, %v2900_v23  ;;  %v2909_v18 = vsel %vm2865_vm7, %v2899_v17, %v2908_v16  ;;  %v2922_v9 = vrot.slane %v2920_v5, 2  ;;  %v3322_v48 = vrot.slane %v5245_v58, 3 }
 0x115   : > { %v5476_v40 = vadd.f32 %v4255_v63, %v804_v50  ;;  %4473 = vmatprep.mubr.msk.bf16.mxu0 %vm454_vm2, %v5142_v37  ;;  %v2923_v50 = vshll.u32 %v5257_v14, 16  ;;  %v811_v39 = vpop.f32.mrf.mxu1  ;;  %v2917_v37 = vor.u32 %v2916_v36, %v2913_v45  ;;  %v2934_v45 = vrot.slane %v2932_v42, 3 }
 0x116   : > { %v1073_v10 = vpop.f32.mrf.mxu0  ;;  %v812_v41 = vadd.f32 %v811_v39, %v5368_v46  ;;  %v2947_v39 = vshrl.u32 %v5291_v8, 16 }
 0x117   : > { %v5483_v29 = vadd.f32 %v1073_v10, %v796_v24  ;;  %v4222_v44 = vpop.f32.mrf.mxu1  ;;  %v2925_v47 = vrot.slane %v2923_v50, 3  ;;  %v2918_v46 = vsel %vm2865_vm7, %v2908_v16, %v2917_v37  ;;  %v2941_v10 = vshll.u32 %v5283_v20, 16 }
 0x118   : > { %v4256_v61 = vpop.f32.mrf.mxu0  ;;  %v823_v51 = vadd.f32 %v4222_v44, %v5375_v13  ;;  %v3320_v13 = vrot.slane %v5239_v59, 3 }
 0x119   : > { %v5491_v2 = vadd.f32 %v4256_v61, %v807_v62  ;;  %v814_v63 = vpop.f32.mrf.mxu1  ;;  %v2931_v62 = vrot.slane %v2929_v60, 2  ;;  %v2950_v61 = vshll.u32 %v5291_v8, 16 }
 0x11a   : > { %v1076_v24 = vpop.f32.mrf.mxu0  ;;  %v815_v17 = vadd.f32 %v814_v63, %v5383_v28  ;;  %v2926_v28 = vor.u32 %v2925_v47, %v2922_v9  ;;  %v3321_v42 = vsel %vm3312_vm6, %v3318_v3, %v3320_v13 }
 0x11b   : > { %v5498_v12 = vadd.f32 %v1076_v24, %v799_v33  ;;  %v4225_v36 = vpop.f32.mrf.mxu1  ;;  %4440 = vmatmul.mubr.msk.bf16.gmra.mxu1 %vm454_vm2, %v2909_v18  ;;  %v2935_v59 = vor.u32 %v2934_v45, %v2931_v62  ;;  %v2943_v18 = vrot.slane %v2941_v10, 3  ;;  %v2952_v3 = vrot.slane %v2950_v61, 3 }
 0x11c   : > { %v4259_v23 = vpop.f32.mrf.mxu0  ;;  %4474 = vmatmul.mubr.msk.bf16.vlgmr.msra.gmra.mxu0 %vm454_vm2, %v5150_v43  ;;  %v2938_v43 = vshrl.u32 %v5283_v20, 16  ;;  %v836_v16 = vadd.f32 %v4225_v36, %v5391_v54  ;;  %4443 = vmatprep.mubr.msk.bf16.mxu1 %vm454_vm2, %v2918_v46  ;;  %v2927_v9 = vsel %vm2865_vm7, %v2917_v37, %v2926_v28  ;;  %v2956_v36 = vshrl.u32 %v5315_v53, 16 }
 0x11d   : > { %v5504_v27 = vadd.f32 %v4259_v23, %v820_v26  ;;  %4477 = vmatprep.mubr.msk.bf16.mxu0 %vm454_vm2, %v3319_v31  ;;  %v827_v26 = vpop.f32.mrf.mxu1 }
 0x11e   : > { %v1089_v33 = vpop.f32.mrf.mxu0  ;;  %v828_v58 = vadd.f32 %v827_v26, %v5398_v32  ;;  %v2940_v24 = vrot.slane %v2938_v43, 2  ;;  %v2936_v32 = vsel %vm2865_vm7, %v2926_v28, %v2935_v59 }
 0x11f   : > { %v5513_v5 = vadd.f32 %v1089_v33, %v812_v41  ;;  %v4226_v44 = vpop.f32.mrf.mxu1  ;;  %v3323_v41 = vsel %vm3312_vm6, %v3320_v13, %v3322_v48 }
 0x120   : > { %v4260_v50 = vpop.f32.mrf.mxu0  ;;  %v839_v0 = vadd.f32 %v4226_v44, %v5404_v11  ;;  %v3324_v11 = vrot.slane %v5257_v14, 3  ;;  %v2944_v45 = vor.u32 %v2943_v18, %v2940_v24  ;;  %v2965_v14 = vshrl.u32 %v5323_v49, 16 }
 0x121   : > { %v5519_v60 = vadd.f32 %v4260_v50, %v823_v51  ;;  %v830_v47 = vpop.f32.mrf.mxu1  ;;  %v2949_v51 = vrot.slane %v2947_v39, 2  ;;  %v2958_v44 = vrot.slane %v2956_v36, 2  ;;  %v2986_v36 = vshll.u32 %v5355_v4, 16 }
 0x122   : > { %v1092_v54 = vpop.f32.mrf.mxu0  ;;  %v831_v23 = vadd.f32 %v830_v47, %v5415_v1  ;;  %v2959_v1 = vshll.u32 %v5315_v53, 16  ;;  %v3325_v26 = vsel %vm3312_vm6, %v3322_v48, %v3324_v11  ;;  %v2945_v39 = vsel %vm2865_vm7, %v2935_v59, %v2944_v45 }
 0x123   : > { %v5524_v31 = vadd.f32 %v1092_v54, %v815_v17  ;;  %v4229_v62 = vpop.f32.mrf.mxu1  ;;  %4444 = vmatmul.mubr.msk.bf16.gmra.mxu1 %vm454_vm2, %v2927_v9  ;;  %v3326_v17 = vrot.slane %v5261_v30, 3  ;;  %v2953_v10 = vor.u32 %v2952_v3, %v2949_v51  ;;  %v2974_v51 = vshrl.u32 %v5347_v56, 16 }
 0x124   : > { %v4263_v63 = vpop.f32.mrf.mxu0  ;;  %4478 = vmatmul.mubr.msk.bf16.gmra.mxu0 %vm454_vm2, %v3321_v42  ;;  %4447 = vmatprep.mubr.msk.bf16.mxu1 %vm454_vm2, %v2936_v32  ;;  %v2961_v54 = vrot.slane %v2959_v1, 3  ;;  %v3330_v32 = vrot.slane %v5291_v8, 3  ;;  %v2977_v3 = vshll.u32 %v5347_v56, 16 }
 0x125   : > { %v5530_v46 = vadd.f32 %v4263_v63, %v836_v16  ;;  %4481 = vmatprep.mubr.msk.bf16.mxu0 %vm454_vm2, %v3323_v41  ;;  %v843_v33 = vpop.f32.mrf.mxu1  ;;  %v2968_v16 = vshll.u32 %v5323_v49, 16  ;;  %v3327_v61 = vsel %vm3312_vm6, %v3324_v11, %v3326_v17  ;;  %v2954_v18 = vsel %vm2865_vm7, %v2944_v45, %v2953_v10 }
 0x126   : > { %v1105_v37 = vpop.f32.mrf.mxu0  ;;  %v844_v9 = vadd.f32 %v843_v33, %v5277_v38  ;;  %v2962_v38 = vor.u32 %v2961_v54, %v2958_v44  ;;  %v2983_v45 = vshrl.u32 %v5355_v4, 16 }
 0x127   : > { %v5536_v13 = vadd.f32 %v1105_v37, %v828_v58  ;;  %v4230_v30 = vpop.f32.mrf.mxu1  ;;  %v852_v58 = vadd.f32 %v4229_v62, %v5268_v52  ;;  %v2970_v48 = vrot.slane %v2968_v16, 3  ;;  %v3328_v52 = vrot.slane %v5283_v20, 3 }
 0x128   : > { %v4264_v43 = vpop.f32.mrf.mxu0  ;;  %v2976_v16 = vrot.slane %v2974_v51, 2  ;;  %v2985_v44 = vrot.slane %v2983_v45, 2 }
 0x129   : > { %v5543_v28 = vadd.f32 %v4264_v43, %v839_v0  ;;  %v846_v41 = vpop.f32.mrf.mxu1  ;;  %v2967_v0 = vrot.slane %v2965_v14, 2  ;;  %v3329_v33 = vsel %vm3312_vm6, %v3326_v17, %v3328_v52  ;;  %v3331_v14 = vsel %vm3312_vm6, %v3328_v52, %v3330_v32 }
 0x12a   : > { %v1108_v50 = vpop.f32.mrf.mxu0  ;;  %v847_v8 = vadd.f32 %v846_v41, %v5293_v25  ;;  %v2988_v17 = vrot.slane %v2986_v36, 3 }
 0x12b   : > { %v5549_v42 = vadd.f32 %v1108_v50, %v831_v23  ;;  %v4233_v59 = vpop.f32.mrf.mxu1  ;;  %4448 = vmatmul.mubr.msk.bf16.gmra.mxu1 %vm454_vm2, %v2945_v39  ;;  %v855_v23 = vadd.f32 %v4230_v30, %v5285_v7  ;;  %v2971_v20 = vor.u32 %v2970_v48, %v2967_v0  ;;  %v2963_v39 = vsel %vm2865_vm7, %v2953_v10, %v2962_v38  ;;  %v6072_v48 = vld [vmem:[#allocation2_spill] sm:$0xff] }
 0x12c   : > { %v4267_v24 = vpop.f32.mrf.mxu0  ;;  %4482 = vmatmul.mubr.msk.bf16.gmra.mxu0 %vm454_vm2, %v3325_v26  ;;  %4451 = vmatprep.mubr.msk.bf16.mxu1 %vm454_vm2, %v2954_v18  ;;  %v2979_v26 = vrot.slane %v2977_v3, 3  ;;  %v868_v30 = vadd.f32 %v4233_v59, %v5300_v34  ;;  %v3332_v34 = vrot.slane %v5315_v53, 3  ;;  %v3334_v0 = vrot.slane %v5323_v49, 3 }
 0x12d   : > { %v5554_v47 = vadd.f32 %v4267_v24, %v852_v58  ;;  %4485 = vmatprep.mubr.msk.bf16.mxu0 %vm454_vm2, %v3327_v61  ;;  %v859_v62 = vpop.f32.mrf.mxu1  ;;  %v2972_v25 = vsel %vm2865_vm7, %v2962_v38, %v2971_v20  ;;  %v2989_v53 = vor.u32 %v2988_v17, %v2985_v44  ;;  %v6077_v17 = vld [vmem:[#allocation5_spill] sm:$0xff] }
 0x12e   : > { %v1121_v63 = vpop.f32.mrf.mxu0  ;;  %v860_v54 = vadd.f32 %v859_v62, %v5309_v35  ;;  %v2980_v18 = vor.u32 %v2979_v26, %v2976_v16  ;;  %v6073_v35 = vld [vmem:[#allocation10_spill] sm:$0xff]  ;;  %v3333_v36 = vsel %vm3312_vm6, %v3330_v32, %v3332_v34 }
 0x12f   : > { %v5563_v11 = vadd.f32 %v1121_v63, %v844_v9  ;;  %v4234_v43 = vpop.f32.mrf.mxu1  ;;  %v2992_v59 = vshrl.u32 %v6073_v35, 16  ;;  %v2995_v63 = vshll.u32 %v6073_v35, 16 }
 0x130   : > { %v4268_v37 = vpop.f32.mrf.mxu0  ;;  %v871_v9 = vadd.f32 %v4234_v43, %v6072_v48  ;;  %v2981_v43 = vsel %vm2865_vm7, %v2971_v20, %v2980_v18  ;;  %v3336_v20 = vrot.slane %v5347_v56, 3  ;;  %v3338_v48 = vrot.slane %v5355_v4, 3  ;;  %v6080_v4 = vld [vmem:[#allocation7_spill] sm:$0xff] }
 0x131   : > { %v5569_v1 = vadd.f32 %v4268_v37, %v855_v23  ;;  %v862_v61 = vpop.f32.mrf.mxu1  ;;  %v6074_v23 = vld [vmem:[#allocation12_spill] sm:$0xff]  ;;  %v6075_v37 = vld [vmem:[#allocation3_spill] sm:$0xff] }
 0x132   : > { %v1124_v7 = vpop.f32.mrf.mxu0  ;;  %v3001_v38 = vshrl.u32 %v6074_v23, 16  ;;  %v3004_v62 = vshll.u32 %v6074_v23, 16  ;;  %v863_v45 = vadd.f32 %v862_v61, %v6075_v37  ;;  %v2990_v61 = vsel %vm2865_vm7, %v2980_v18, %v2989_v53  ;;  %v6079_v37 = vld [vmem:[#allocation14_spill] sm:$0xff] }
 0x133   : > { %v5574_v50 = vadd.f32 %v1124_v7, %v847_v8  ;;  %v4237_v24 = vpop.f32.mrf.mxu1  ;;  %4452 = vmatmul.mubr.msk.bf16.gmra.mxu1 %vm454_vm2, %v2963_v39  ;;  %v3335_v7 = vsel %vm3312_vm6, %v3332_v34, %v3334_v0  ;;  %v2997_v39 = vrot.slane %v2995_v63, 3  ;;  %v3013_v18 = vshll.u32 %v5413_v57, 16 }
 0x134   : > { %v4271_v58 = vpop.f32.mrf.mxu0  ;;  %4486 = vmatmul.mubr.msk.bf16.gmra.mxu0 %vm454_vm2, %v3329_v33  ;;  %4455 = vmatprep.mubr.msk.bf16.mxu1 %vm454_vm2, %v2972_v25  ;;  %v3003_v44 = vrot.slane %v3001_v38, 2  ;;  %v3006_v32 = vrot.slane %v3004_v62, 3 }
 0x135   : > { %v5580_v41 = vadd.f32 %v4271_v58, %v868_v30  ;;  %4489 = vmatprep.mubr.msk.bf16.mxu0 %vm454_vm2, %v3331_v14  ;;  %v875_v51 = vpop.f32.mrf.mxu1  ;;  %v6076_v14 = vld [vmem:[#allocation4_spill] sm:$0xff]  ;;  %v2994_v30 = vrot.slane %v2992_v59, 2  ;;  %v6078_v59 = vld [vmem:[#allocation6_spill] sm:$0xff] }
 0x136   : > { %v1137_v10 = vpop.f32.mrf.mxu0  ;;  %v884_v16 = vadd.f32 %v4237_v24, %v6076_v14  ;;  %v3007_v62 = vor.u32 %v3006_v32, %v3003_v44 }
 0x137   : > { %v5587_v52 = vadd.f32 %v1137_v10, %v860_v54  ;;  %v4238_v8 = vpop.f32.mrf.mxu1  ;;  %v876_v54 = vadd.f32 %v875_v51, %v6077_v17  ;;  %v2998_v51 = vor.u32 %v2997_v39, %v2994_v30  ;;  %v5626_v30 = vld [vmem:[%s4649_s23 + $0xa0] ss:$0 sps:$4 sm:$0x77]   ;;  %v6081_v39 = vld [vmem:[#allocation8_spill] sm:$0xff] }
 0x138   : > { %v4272_v3 = vpop.f32.mrf.mxu0  ;;  %v887_v63 = vadd.f32 %v4238_v8, %v6078_v59 }
 0x139   : > { %v5595_v49 = vadd.f32 %v4272_v3, %v871_v9  ;;  %v878_v58 = vpop.f32.mrf.mxu1  ;;  %v3010_v9 = vshrl.u32 %v5413_v57, 16  ;;  %v2999_v17 = vsel %vm2865_vm7, %v2989_v53, %v2998_v51 }
 0x13a   : > { %v1140_v33 = vpop.f32.mrf.mxu0 }
 0x13b   : > { %v5601_v26 = vadd.f32 %v1140_v33, %v863_v45  ;;  %v4241_v34 = vpop.f32.mrf.mxu1  ;;  %4456 = vmatmul.mubr.msk.bf16.gmra.mxu1 %vm454_vm2, %v2981_v43  ;;  %v3019_v45 = vshrl.u32 %v6079_v37, 16  ;;  %v879_v33 = vadd.f32 %v878_v58, %v6080_v4  ;;  %v3342_v4 = vrot.slane %v6074_v23, 3 }
 0x13c   : > { %v4275_v25 = vpop.f32.mrf.mxu0  ;;  %4490 = vmatmul.mubr.msk.bf16.gmra.mxu0 %vm454_vm2, %v3333_v36  ;;  %4459 = vmatprep.mubr.msk.bf16.mxu1 %vm454_vm2, %v2990_v61  ;;  %v3022_v36 = vshll.u32 %v6079_v37, 16  ;;  %v3015_v61 = vrot.slane %v3013_v18, 3  ;;  %v900_v44 = vadd.f32 %v4241_v34, %v6081_v39  ;;  %v3340_v34 = vrot.slane %v6073_v35, 3 }
 0x13d   : > { %v5606_v10 = vadd.f32 %v4275_v25, %v884_v16  ;;  %4493 = vmatprep.mubr.msk.bf16.mxu0 %vm454_vm2, %v3335_v7  ;;  %v891_v38 = vpop.f32.mrf.mxu1  ;;  %v3337_v7 = vsel %vm3312_vm6, %v3334_v0, %v3336_v20  ;;  %v3339_v16 = vsel %vm3312_vm6, %v3336_v20, %v3338_v48  ;;  %v3012_v25 = vrot.slane %v3010_v9, 2 }
 0x13e   : > { %v1153_v24 = vpop.f32.mrf.mxu0  ;;  %v3008_v0 = vsel %vm2865_vm7, %v2998_v51, %v3007_v62  ;;  %v3024_v59 = vrot.slane %v3022_v36, 3  ;;  %v6083_v51 = vld [vmem:[#allocation11_spill] sm:$0xff] }
 0x13f   : > { %v5615_v3 = vadd.f32 %v1153_v24, %v876_v54  ;;  %v4242_v8 = vpop.f32.mrf.mxu1  ;;  %v3021_v24 = vrot.slane %v3019_v45, 2  ;;  %v6084_v36 = vld [vmem:[#allocation15_spill] sm:$0xff] }
 0x140   : > { %v4276_v56 = vpop.f32.mrf.mxu0  ;;  %v903_v45 = vadd.f32 %v4242_v8, %v6083_v51 }
 0x141   : > { %v5621_v43 = vadd.f32 %v4276_v56, %v887_v63  ;;  %v894_v54 = vpop.f32.mrf.mxu1  ;;  %v6082_v63 = vld [vmem:[#allocation9_spill] sm:$0xff]  ;;  %v3016_v56 = vor.u32 %v3015_v61, %v3012_v25  ;;  %v3025_v39 = vor.u32 %v3024_v59, %v3021_v24  ;;  %v6086_v25 = vld [vmem:[#allocation16_spill] sm:$0xff] }
 0x142   : > { %v1156_v14 = vpop.f32.mrf.mxu0  ;;  %v892_v20 = vadd.f32 %v891_v38, %v6082_v63 }
 0x143   : > { %v5629_v32 = vadd.f32 %v1156_v14, %v879_v33  ;;  %v4285_v18 = vpop.f32.mrf.mxu1  ;;  %4460 = vmatmul.mubr.msk.bf16.gmra.mxu1 %vm454_vm2, %v2999_v17  ;;  %v3028_v33 = vshrl.u32 %v5626_v30, 16  ;;  %v3031_v14 = vshll.u32 %v5626_v30, 16 }
 0x144   : > { %v4279_v58 = vpop.f32.mrf.mxu0  ;;  %4494 = vmatmul.mubr.msk.bf16.gmra.mxu0 %vm454_vm2, %v3337_v7  ;;  %v1625_v7 = vadd.f32 %v4285_v18, %v6084_v36  ;;  %4463 = vmatprep.mubr.msk.bf16.mxu1 %vm454_vm2, %v3008_v0  ;;  %v3343_v18 = vsel %vm3312_vm6, %v3340_v34, %v3342_v4 }
 0x145   : > { %v5635_v9 = vadd.f32 %v4279_v58, %v900_v44  ;;  %4497 = vmatprep.mubr.msk.bf16.mxu0 %vm454_vm2, %v3339_v16  ;;  %v1480_v35 = vpop.f32.mrf.mxu1  ;;  %v6085_v44 = vld [vmem:[#allocation13_spill] sm:$0xff]  ;;  %v3341_v58 = vsel %vm3312_vm6, %v3338_v48, %v3340_v34  ;;  %v3030_v51 = vrot.slane %v3028_v33, 2  ;;  %v3033_v24 = vrot.slane %v3031_v14, 3 }
 0x146   : > { %v1169_v53 = vpop.f32.mrf.mxu0  ;;  %v895_v17 = vadd.f32 %v894_v54, %v6085_v44  ;;  %v1623_v61 = vadd.f32 %v1480_v35, %v6086_v25  ;;  %v3346_v33 = vrot.slane %v6079_v37, 3 }
 0x147   : > { %v5644_v38 = vadd.f32 %v1169_v53, %v892_v20  ;;  %v4286_v8 = vpop.f32.mrf.mxu1  ;;  %v3017_v20 = vsel %vm2865_vm7, %v3007_v62, %v3016_v56  ;;  %v3344_v62 = vrot.slane %v5413_v57, 3 }
 0x148   : > { %v4280_v16 = vpop.f32.mrf.mxu0  ;;  %v1626_v0 = vadd.f32 %v4286_v8, %v5441_v19 }
 0x149   : > { %v5650_v23 = vadd.f32 %v4280_v16, %v903_v45  ;;  %v1483_v59 = vpop.f32.mrf.mxu1  ;;  %v3026_v45 = vsel %vm2865_vm7, %v3016_v56, %v3025_v39  ;;  %v3034_v56 = vor.u32 %v3033_v24, %v3030_v51  ;;  %v3345_v57 = vsel %vm3312_vm6, %v3342_v4, %v3344_v62 }
 0x14a   : > { %v1172_v63 = vpop.f32.mrf.mxu0  ;;  %v1624_v48 = vadd.f32 %v1483_v59, %v5447_v21  ;;  %v3348_v4 = vrot.slane %v5626_v30, 3 }
 0x14b   : > { %v5656_v53 = vadd.f32 %v1172_v63, %v895_v17  ;;  %v4289_v34 = vpop.f32.mrf.mxu1  ;;  %4464 = vmatmul.mubr.msk.bf16.gmra.mxu1 %vm454_vm2, %v3017_v20 }
 0x14c   : > { %v4323_v54 = vpop.f32.mrf.mxu0  ;;  %4498 = vmatmul.mubr.msk.bf16.gmra.mxu0 %vm454_vm2, %v3341_v58  ;;  %v1629_v14 = vadd.f32 %v4289_v34, %v5452_v15  ;;  %4467 = vmatprep.mubr.msk.bf16.mxu1 %vm454_vm2, %v3026_v45  ;;  %v3347_v58 = vsel %vm3312_vm6, %v3344_v62, %v3346_v33 }
 0x14d   : > { %v5661_v36 = vadd.f32 %v4323_v54, %v1625_v7  ;;  %4501 = vmatprep.mubr.msk.bf16.mxu0 %vm454_vm2, %v3343_v18  ;;  %v1496_v21 = vpop.f32.mrf.mxu1 }
 0x14e   : > { %v1927_v19 = vpop.f32.mrf.mxu0  ;;  %v1627_v16 = vadd.f32 %v1496_v21, %v5460_v6 }
 0x14f   : > { %v5668_v35 = vadd.f32 %v1927_v19, %v1623_v61  ;;  %v4290_v17 = vpop.f32.mrf.mxu1  ;;  %v3035_v61 = vsel %vm2865_vm7, %v3025_v39, %v3034_v56 }
 0x150   : > { %v4324_v7 = vpop.f32.mrf.mxu0  ;;  %v1630_v37 = vadd.f32 %v4290_v17, %v5466_v22 }
 0x151   : > { %v5672_v44 = vadd.f32 %v4324_v7, %v1626_v0  ;;  %v1499_v8 = vpop.f32.mrf.mxu1 }
 0x152   : > { %v1930_v25 = vpop.f32.mrf.mxu0  ;;  %v1628_v6 = vadd.f32 %v1499_v8, %v5470_v55  ;;  %v3349_v55 = vsel %vm3312_vm6, %v3346_v33, %v3348_v4 }
 0x153   : > { %v5677_v15 = vadd.f32 %v1930_v25, %v1624_v48  ;;  %v4293_v18 = vpop.f32.mrf.mxu1  ;;  %4468 = vmatmul.mubr.msk.bf16.gmra.mxu1 %vm454_vm2, %v3035_v61 }
 0x154   : > { %v4327_v63 = vpop.f32.mrf.mxu0  ;;  %4502 = vmatmul.mubr.msk.bf16.gmra.mxu0 %vm454_vm2, %v3345_v57  ;;  %v1633_v0 = vadd.f32 %v4293_v18, %v5476_v40 }
 0x155   : > { %v5682_v20 = vadd.f32 %v4327_v63, %v1629_v14  ;;  %4505 = vmatprep.mubr.msk.bf16.mxu0 %vm454_vm2, %v3347_v58  ;;  %v1512_v39 = vpop.f32.mrf.mxu1 }
 0x156   : > { %v1943_v22 = vpop.f32.mrf.mxu0  ;;  %v1631_v59 = vadd.f32 %v1512_v39, %v5483_v29 }
 0x157   : > { %v5688_v51 = vadd.f32 %v1943_v22, %v1627_v16  ;;  %v4294_v45 = vpop.f32.mrf.mxu1 }
 0x158   : > { %v4328_v24 = vpop.f32.mrf.mxu0  ;;  %v1634_v30 = vadd.f32 %v4294_v45, %v5491_v2 }
 0x159   : > { %v5691_v54 = vadd.f32 %v4328_v24, %v1630_v37  ;;  %v1515_v34 = vpop.f32.mrf.mxu1 }
 0x15a   : > { %v1946_v48 = vpop.f32.mrf.mxu0  ;;  %v1632_v40 = vadd.f32 %v1515_v34, %v5498_v12 }
 0x15b   : > { %v5695_v62 = vadd.f32 %v1946_v48, %v1628_v6  ;;  %v4297_v56 = vpop.f32.mrf.mxu1 }
 0x15c   : > { %v4331_v19 = vpop.f32.mrf.mxu0  ;;  %4506 = vmatmul.mubr.msk.bf16.gmra.mxu0 %vm454_vm2, %v3349_v55  ;;  %v1637_v21 = vadd.f32 %v4297_v56, %v5504_v27 }
 0x15d   : > { %v5699_v14 = vadd.f32 %v4331_v19, %v1633_v0  ;;  %v1528_v33 = vpop.f32.mrf.mxu1 }
 0x15e   : > { %v1959_v29 = vpop.f32.mrf.mxu0  ;;  %v1635_v2 = vadd.f32 %v1528_v33, %v5513_v5 }
 0x15f   : > { %v5702_v7 = vadd.f32 %v1959_v29, %v1631_v59  ;;  %v4298_v17 = vpop.f32.mrf.mxu1 }
 0x160   : > { %v4332_v16 = vpop.f32.mrf.mxu0  ;;  %v1638_v58 = vadd.f32 %v4298_v17, %v5519_v60 }
 0x161   : > { %v5705_v57 = vadd.f32 %v4332_v16, %v1634_v30  ;;  %v1531_v12 = vpop.f32.mrf.mxu1 }
 0x162   : > { %v1962_v25 = vpop.f32.mrf.mxu0  ;;  %v1636_v8 = vadd.f32 %v1531_v12, %v5524_v31 }
 0x163   : > { %v5708_v37 = vadd.f32 %v1962_v25, %v1632_v40  ;;  %v4301_v27 = vpop.f32.mrf.mxu1 }
 0x164   : > { %v4335_v61 = vpop.f32.mrf.mxu0  ;;  %v1641_v4 = vadd.f32 %v4301_v27, %v5530_v46 }
 0x165   : > { %v5711_v63 = vadd.f32 %v4335_v61, %v1637_v21  ;;  %v1544_v5 = vpop.f32.mrf.mxu1 }
 0x166   : > { %v1975_v6 = vpop.f32.mrf.mxu0  ;;  %v1639_v0 = vadd.f32 %v1544_v5, %v5536_v13 }
 0x167   : > { %v5714_v18 = vadd.f32 %v1975_v6, %v1635_v2  ;;  %v4302_v60 = vpop.f32.mrf.mxu1 }
 0x168   : > { %v4336_v22 = vpop.f32.mrf.mxu0  ;;  %v1642_v59 = vadd.f32 %v4302_v60, %v5543_v28 }
 0x169   : > { %v5717_v39 = vadd.f32 %v4336_v22, %v1638_v58  ;;  %v1547_v31 = vpop.f32.mrf.mxu1 }
 0x16a   : > { %v1978_v24 = vpop.f32.mrf.mxu0  ;;  %v1640_v48 = vadd.f32 %v1547_v31, %v5549_v42 }
 0x16b   : > { %v5720_v55 = vadd.f32 %v1978_v24, %v1636_v8  ;;  %v4305_v46 = vpop.f32.mrf.mxu1 }
 0x16c   : > { %v4339_v45 = vpop.f32.mrf.mxu0  ;;  %v1645_v19 = vadd.f32 %v4305_v46, %v5554_v47 }
 0x16d   : > { %v5723_v30 = vadd.f32 %v4339_v45, %v1641_v4  ;;  %v1560_v13 = vpop.f32.mrf.mxu1 }
 0x16e   : > { %v1991_v34 = vpop.f32.mrf.mxu0  ;;  %v1643_v29 = vadd.f32 %v1560_v13, %v5563_v11 }
 0x16f   : > { %v5726_v40 = vadd.f32 %v1991_v34, %v1639_v0  ;;  %v4306_v28 = vpop.f32.mrf.mxu1 }
 0x170   : > { %v4340_v56 = vpop.f32.mrf.mxu0  ;;  %v1646_v16 = vadd.f32 %v4306_v28, %v5569_v1 }
 0x171   : > { %v5729_v21 = vadd.f32 %v4340_v56, %v1642_v59  ;;  %v1563_v42 = vpop.f32.mrf.mxu1 }
 0x172   : > { %v1994_v33 = vpop.f32.mrf.mxu0  ;;  %v1644_v25 = vadd.f32 %v1563_v42, %v5574_v50 }
 0x173   : > { %v5732_v2 = vadd.f32 %v1994_v33, %v1640_v48  ;;  %v4309_v47 = vpop.f32.mrf.mxu1 }
 0x174   : > { %v4343_v17 = vpop.f32.mrf.mxu0  ;;  %v1649_v61 = vadd.f32 %v4309_v47, %v5580_v41 }
 0x175   : > { %v5735_v58 = vadd.f32 %v4343_v17, %v1645_v19  ;;  %v1576_v11 = vpop.f32.mrf.mxu1 }
 0x176   : > { %v2007_v12 = vpop.f32.mrf.mxu0  ;;  %v1647_v6 = vadd.f32 %v1576_v11, %v5587_v52 }
 0x177   : > { %v5738_v8 = vadd.f32 %v2007_v12, %v1643_v29  ;;  %v4310_v1 = vpop.f32.mrf.mxu1 }
 0x178   : > { %v4344_v27 = vpop.f32.mrf.mxu0  ;;  %v1650_v22 = vadd.f32 %v4310_v1, %v5595_v49 }
 0x179   : > { %v5741_v4 = vadd.f32 %v4344_v27, %v1646_v16  ;;  %v1579_v50 = vpop.f32.mrf.mxu1 }
 0x17a   : > { %v2010_v5 = vpop.f32.mrf.mxu0  ;;  %v1648_v24 = vadd.f32 %v1579_v50, %v5601_v26 }
 0x17b   : > { %v5744_v0 = vadd.f32 %v2010_v5, %v1644_v25  ;;  %v4313_v41 = vpop.f32.mrf.mxu1 }
 0x17c   : > { %v4347_v60 = vpop.f32.mrf.mxu0  ;;  %v1653_v45 = vadd.f32 %v4313_v41, %v5606_v10 }
 0x17d   : > { %v5747_v59 = vadd.f32 %v4347_v60, %v1649_v61  ;;  %v1592_v52 = vpop.f32.mrf.mxu1 }
 0x17e   : > { %v2023_v31 = vpop.f32.mrf.mxu0  ;;  %v1651_v34 = vadd.f32 %v1592_v52, %v5615_v3 }
 0x17f   : > { %v5750_v48 = vadd.f32 %v2023_v31, %v1647_v6  ;;  %v4314_v49 = vpop.f32.mrf.mxu1 }
 0x180   : > { %v4348_v46 = vpop.f32.mrf.mxu0  ;;  %v1654_v56 = vadd.f32 %v4314_v49, %v5621_v43 }
 0x181   : > { %v5753_v19 = vadd.f32 %v4348_v46, %v1650_v22  ;;  %v1595_v26 = vpop.f32.mrf.mxu1 }
 0x182   : > { %v2026_v13 = vpop.f32.mrf.mxu0  ;;  %v1652_v33 = vadd.f32 %v1595_v26, %v5629_v32 }
 0x183   : > { %v5756_v29 = vadd.f32 %v2026_v13, %v1648_v24  ;;  %v4317_v10 = vpop.f32.mrf.mxu1 }
 0x184   : > { %v4351_v28 = vpop.f32.mrf.mxu0  ;;  %v1657_v17 = vadd.f32 %v4317_v10, %v5635_v9 }
 0x185   : > { %v5759_v16 = vadd.f32 %v4351_v28, %v1653_v45  ;;  %v1608_v3 = vpop.f32.mrf.mxu1 }
 0x186   : > { %v2039_v42 = vpop.f32.mrf.mxu0  ;;  %v1655_v12 = vadd.f32 %v1608_v3, %v5644_v38 }
 0x187   : > { %v5762_v25 = vadd.f32 %v2039_v42, %v1651_v34  ;;  %v4318_v43 = vpop.f32.mrf.mxu1 }
 0x188   : > { %v4352_v47 = vpop.f32.mrf.mxu0  ;;  %v1658_v27 = vadd.f32 %v4318_v43, %v5650_v23 }
 0x189   : > { %v5765_v61 = vadd.f32 %v4352_v47, %v1654_v56  ;;  %v1611_v32 = vpop.f32.mrf.mxu1 }
 0x18a   : > { %v2042_v11 = vpop.f32.mrf.mxu0  ;;  %v1656_v5 = vadd.f32 %v1611_v32, %v5656_v53 }
 0x18b   : > { %v5768_v6 = vadd.f32 %v2042_v11, %v1652_v33  ;;  %v4361_v9 = vpop.f32.mrf.mxu1 }
 0x18c   : > { %v4355_v1 = vpop.f32.mrf.mxu0  ;;  %v2386_v60 = vadd.f32 %v4361_v9, %v5661_v36 }
 0x18d   : > { %v5771_v22 = vadd.f32 %v4355_v1, %v1657_v17  ;;  %v2241_v38 = vpop.f32.mrf.mxu1 }
 0x18e   : > { %v2055_v50 = vpop.f32.mrf.mxu0  ;;  %v2384_v31 = vadd.f32 %v2241_v38, %v5668_v35 }
 0x18f   : > { %v5774_v24 = vadd.f32 %v2055_v50, %v1655_v12  ;;  %v4362_v23 = vpop.f32.mrf.mxu1 }
 0x190   : > { %v4356_v41 = vpop.f32.mrf.mxu0  ;;  %v2387_v46 = vadd.f32 %v4362_v23, %v5672_v44 }
 0x191   : > { %v5777_v45 = vadd.f32 %v4356_v41, %v1658_v27  ;;  %v2244_v53 = vpop.f32.mrf.mxu1 }
 0x192   : > { %v2058_v52 = vpop.f32.mrf.mxu0  ;;  %v2385_v13 = vadd.f32 %v2244_v53, %v5677_v15 }
 0x193   : > { %v5780_v34 = vadd.f32 %v2058_v52, %v1656_v5  ;;  %v4365_v36 = vpop.f32.mrf.mxu1 }
 0x194   : > { %v4399_v49 = vpop.f32.mrf.mxu0  ;;  %v2390_v28 = vadd.f32 %v4365_v36, %v5682_v20 }
 0x195   : > { %v5783_v56 = vadd.f32 %v4399_v49, %v2386_v60  ;;  %v2257_v35 = vpop.f32.mrf.mxu1 }
 0x196   : > { %v2680_v26 = vpop.f32.mrf.mxu0  ;;  %v2388_v42 = vadd.f32 %v2257_v35, %v5688_v51 }
 0x197   : > { %v5786_v33 = vadd.f32 %v2680_v26, %v2384_v31  ;;  %v4366_v44 = vpop.f32.mrf.mxu1 }
 0x198   : > { %v4400_v10 = vpop.f32.mrf.mxu0  ;;  %v2391_v47 = vadd.f32 %v4366_v44, %v5691_v54 }
 0x199   : > { %v5789_v17 = vadd.f32 %v4400_v10, %v2387_v46  ;;  %v2260_v15 = vpop.f32.mrf.mxu1 }
 0x19a   : > { %v2683_v3 = vpop.f32.mrf.mxu0  ;;  %v2389_v11 = vadd.f32 %v2260_v15, %v5695_v62 }
 0x19b   : > { %v5792_v12 = vadd.f32 %v2683_v3, %v2385_v13  ;;  %v4369_v20 = vpop.f32.mrf.mxu1 }
 0x19c   : > { %v4403_v43 = vpop.f32.mrf.mxu0  ;;  %v2394_v1 = vadd.f32 %v4369_v20, %v5699_v14 }
 0x19d   : > { %v5795_v27 = vadd.f32 %v4403_v43, %v2390_v28  ;;  %v2273_v51 = vpop.f32.mrf.mxu1 }
 0x19e   : > { %v2696_v32 = vpop.f32.mrf.mxu0  ;;  %v2392_v50 = vadd.f32 %v2273_v51, %v5702_v7 }
 0x19f   : > { %v5798_v5 = vadd.f32 %v2696_v32, %v2388_v42  ;;  %v4370_v54 = vpop.f32.mrf.mxu1 }
 0x1a0   : > { %v4404_v9 = vpop.f32.mrf.mxu0  ;;  %v2395_v41 = vadd.f32 %v4370_v54, %v5705_v57 }
 0x1a1   : > { %v5801_v60 = vadd.f32 %v4404_v9, %v2391_v47  ;;  %v2276_v62 = vpop.f32.mrf.mxu1 }
 0x1a2   : > { %v2699_v38 = vpop.f32.mrf.mxu0  ;;  %v2393_v52 = vadd.f32 %v2276_v62, %v5708_v37 }
 0x1a3   : > { %v5804_v31 = vadd.f32 %v2699_v38, %v2389_v11  ;;  %v4373_v14 = vpop.f32.mrf.mxu1 }
 0x1a4   : > { %v4407_v23 = vpop.f32.mrf.mxu0  ;;  %v2398_v49 = vadd.f32 %v4373_v14, %v5711_v63 }
 0x1a5   : > { %v5807_v46 = vadd.f32 %v4407_v23, %v2394_v1  ;;  %v2289_v7 = vpop.f32.mrf.mxu1 }
 0x1a6   : > { %v2712_v53 = vpop.f32.mrf.mxu0  ;;  %v2396_v26 = vadd.f32 %v2289_v7, %v5714_v18 }
 0x1a7   : > { %v5810_v13 = vadd.f32 %v2712_v53, %v2392_v50  ;;  %v4374_v57 = vpop.f32.mrf.mxu1 }
 0x1a8   : > { %v4408_v36 = vpop.f32.mrf.mxu0  ;;  %v2399_v10 = vadd.f32 %v4374_v57, %v5717_v39 }
 0x1a9   : > { %v5813_v28 = vadd.f32 %v4408_v36, %v2395_v41  ;;  %v2292_v37 = vpop.f32.mrf.mxu1 }
 0x1aa   : > { %v2715_v35 = vpop.f32.mrf.mxu0  ;;  %v2397_v3 = vadd.f32 %v2292_v37, %v5720_v55 }
 0x1ab   : > { %v5816_v42 = vadd.f32 %v2715_v35, %v2393_v52  ;;  %v4377_v63 = vpop.f32.mrf.mxu1 }
 0x1ac   : > { %v4411_v44 = vpop.f32.mrf.mxu0  ;;  %v2402_v43 = vadd.f32 %v4377_v63, %v5723_v30 }
 0x1ad   : > { %v5819_v47 = vadd.f32 %v4411_v44, %v2398_v49  ;;  %v2305_v18 = vpop.f32.mrf.mxu1 }
 0x1ae   : > { %v2728_v15 = vpop.f32.mrf.mxu0  ;;  %v2400_v32 = vadd.f32 %v2305_v18, %v5726_v40 }
 0x1af   : > { %v5822_v11 = vadd.f32 %v2728_v15, %v2396_v26  ;;  %v4378_v39 = vpop.f32.mrf.mxu1 }
 0x1b0   : > { %v4412_v20 = vpop.f32.mrf.mxu0  ;;  %v2403_v9 = vadd.f32 %v4378_v39, %v5729_v21 }
 0x1b1   : > { %v5825_v1 = vadd.f32 %v4412_v20, %v2399_v10  ;;  %v2308_v55 = vpop.f32.mrf.mxu1 }
 0x1b2   : > { %v2731_v51 = vpop.f32.mrf.mxu0  ;;  %v2401_v38 = vadd.f32 %v2308_v55, %v5732_v2 }
 0x1b3   : > { %v5828_v50 = vadd.f32 %v2731_v51, %v2397_v3  ;;  %v4381_v30 = vpop.f32.mrf.mxu1 }
 0x1b4   : > { %v4415_v54 = vpop.f32.mrf.mxu0  ;;  %v2406_v23 = vadd.f32 %v4381_v30, %v5735_v58 }
 0x1b5   : > { %v5831_v41 = vadd.f32 %v4415_v54, %v2402_v43  ;;  %v2321_v40 = vpop.f32.mrf.mxu1 }
 0x1b6   : > { %v2744_v62 = vpop.f32.mrf.mxu0  ;;  %v2404_v53 = vadd.f32 %v2321_v40, %v5738_v8 }
 0x1b7   : > { %v5834_v52 = vadd.f32 %v2744_v62, %v2400_v32  ;;  %v4382_v21 = vpop.f32.mrf.mxu1 }
 0x1b8   : > { %v4416_v14 = vpop.f32.mrf.mxu0  ;;  %v2407_v36 = vadd.f32 %v4382_v21, %v5741_v4 }
 0x1b9   : > { %v5837_v49 = vadd.f32 %v4416_v14, %v2403_v9  ;;  %v2324_v2 = vpop.f32.mrf.mxu1 }
 0x1ba   : > { %v2747_v7 = vpop.f32.mrf.mxu0  ;;  %v2405_v35 = vadd.f32 %v2324_v2, %v5744_v0 }
 0x1bb   : > { %v5840_v26 = vadd.f32 %v2747_v7, %v2401_v38  ;;  %v4385_v58 = vpop.f32.mrf.mxu1 }
 0x1bc   : > { %v4419_v57 = vpop.f32.mrf.mxu0  ;;  %v2410_v44 = vadd.f32 %v4385_v58, %v5747_v59 }
 0x1bd   : > { %v5843_v10 = vadd.f32 %v4419_v57, %v2406_v23  ;;  %v2337_v8 = vpop.f32.mrf.mxu1 }
 0x1be   : > { %v2760_v37 = vpop.f32.mrf.mxu0  ;;  %v2408_v15 = vadd.f32 %v2337_v8, %v5750_v48 }
 0x1bf   : > { %v5846_v3 = vadd.f32 %v2760_v37, %v2404_v53  ;;  %v4386_v4 = vpop.f32.mrf.mxu1 }
 0x1c0   : > { %v4420_v63 = vpop.f32.mrf.mxu0  ;;  %v2411_v20 = vadd.f32 %v4386_v4, %v5753_v19 }
 0x1c1   : > { %v5849_v43 = vadd.f32 %v4420_v63, %v2407_v36  ;;  %v2340_v0 = vpop.f32.mrf.mxu1 }
 0x1c2   : > { %v2763_v18 = vpop.f32.mrf.mxu0  ;;  %v2409_v51 = vadd.f32 %v2340_v0, %v5756_v29 }
 0x1c3   : > { %v5852_v32 = vadd.f32 %v2763_v18, %v2405_v35  ;;  %v4389_v59 = vpop.f32.mrf.mxu1 }
 0x1c4   : > { %v4423_v39 = vpop.f32.mrf.mxu0  ;;  %v2414_v54 = vadd.f32 %v4389_v59, %v5759_v16 }
 0x1c5   : > { %v5855_v9 = vadd.f32 %v4423_v39, %v2410_v44  ;;  %v2353_v48 = vpop.f32.mrf.mxu1 }
 0x1c6   : > { %v2776_v55 = vpop.f32.mrf.mxu0  ;;  %v2412_v62 = vadd.f32 %v2353_v48, %v5762_v25 }
 0x1c7   : > { %v5858_v38 = vadd.f32 %v2776_v55, %v2408_v15  ;;  %v4390_v19 = vpop.f32.mrf.mxu1 }
 0x1c8   : > { %v4424_v30 = vpop.f32.mrf.mxu0  ;;  %v2415_v14 = vadd.f32 %v4390_v19, %v5765_v61 }
 0x1c9   : > { %v5861_v23 = vadd.f32 %v4424_v30, %v2411_v20  ;;  %v2356_v29 = vpop.f32.mrf.mxu1 }
 0x1ca   : > { %v2779_v40 = vpop.f32.mrf.mxu0  ;;  %v2413_v7 = vadd.f32 %v2356_v29, %v5768_v6 }
 0x1cb   : > { %v5864_v53 = vadd.f32 %v2779_v40, %v2409_v51  ;;  %v4393_v16 = vpop.f32.mrf.mxu1 }
 0x1cc   : > { %v4427_v21 = vpop.f32.mrf.mxu0  ;;  %v2418_v57 = vadd.f32 %v4393_v16, %v5771_v22 }
 0x1cd   : > { %v5867_v36 = vadd.f32 %v4427_v21, %v2414_v54  ;;  %v2369_v25 = vpop.f32.mrf.mxu1 }
 0x1ce   : > { %v2792_v2 = vpop.f32.mrf.mxu0  ;;  %v2416_v37 = vadd.f32 %v2369_v25, %v5774_v24 }
 0x1cf   : > { %v5870_v35 = vadd.f32 %v2792_v2, %v2412_v62  ;;  %v4394_v61 = vpop.f32.mrf.mxu1 }
 0x1d0   : > { %v4428_v58 = vpop.f32.mrf.mxu0  ;;  %v2419_v63 = vadd.f32 %v4394_v61, %v5777_v45 }
 0x1d1   : > { %v5873_v44 = vadd.f32 %v4428_v58, %v2415_v14  ;;  %v2372_v15 = vpop.f32.mrf.mxu1 }
 0x1d2   : > { %v2795_v8 = vpop.f32.mrf.mxu0  ;;  %v2417_v18 = vadd.f32 %v2372_v15, %v5780_v34  ;;  %v5892_v34 = vld [vmem:[%s6047_s2] ss:$0 sm:$0xff] }
 0x1d3   : > { %v5876_v6 = vadd.f32 %v2795_v8, %v2413_v7  ;;  %v4437_v20 = vpop.f32.mrf.mxu1 }
 0x1d4   : > { %v4431_v4 = vpop.f32.mrf.mxu0  ;;  %v3272_v45 = vadd.f32 %v4437_v20, %v5783_v56 }
 0x1d5   : > { %v5879_v22 = vadd.f32 %v4431_v4, %v2418_v57  ;;  %v3127_v24 = vpop.f32.mrf.mxu1 }
 0x1d6   : > { %v2808_v0 = vpop.f32.mrf.mxu0  ;;  %v3270_v19 = vadd.f32 %v3127_v24, %v5786_v33 }
 0x1d7   : > { %v5881_v39 = vadd.f32 %v2808_v0, %v2416_v37  ;;  %v4438_v55 = vpop.f32.mrf.mxu1 }
 0x1d8   : > { %v4432_v51 = vpop.f32.mrf.mxu0  ;;  %v3273_v29 = vadd.f32 %v4438_v55, %v5789_v17 }
 0x1d9   : > { %v5883_v59 = vadd.f32 %v4432_v51, %v2419_v63  ;;  %v3130_v30 = vpop.f32.mrf.mxu1 }
 0x1da   : > { %v2811_v54 = vpop.f32.mrf.mxu0  ;;  %v3271_v33 = vadd.f32 %v3130_v30, %v5792_v12 }
 0x1db   : > { %v5887_v48 = vadd.f32 %v2811_v54, %v2417_v18  ;;  %v4441_v14 = vpop.f32.mrf.mxu1 }
 0x1dc   : > { %v4475_v62 = vpop.f32.mrf.mxu0  ;;  %v3276_v61 = vadd.f32 %v4441_v14, %v5795_v27 }
 0x1dd   : > { %v3586_v40 = vadd.f32 %v4475_v62, %v3272_v45  ;;  %v3143_v16 = vpop.f32.mrf.mxu1 }
 0x1de   : > { %v3441_v56 = vpop.f32.mrf.mxu0  ;;  %v3274_v12 = vadd.f32 %v3143_v16, %v5798_v5 }
 0x1df   : > { %v3629_v21 = vadd.f32 %v5892_v34, %v3586_v40  ;;  %v3584_v7 = vadd.f32 %v3441_v56, %v3270_v19  ;;  %v4442_v58 = vpop.f32.mrf.mxu1 }
 0x1e0   : > { %v4476_v2 = vpop.f32.mrf.mxu0  ;;  %v3277_v27 = vadd.f32 %v4442_v58, %v5801_v60 }
 0x1e1   : > { %3665 = vst.msk [vmem:[%s5898_s16 + $0x10] sm:$0xff] %vm454_vm2, %v3629_v21  ;;  %v3627_v57 = vadd.f32 %v5892_v34, %v3584_v7  ;;  %v3587_v25 = vadd.f32 %v4476_v2, %v3273_v29  ;;  %v3146_v63 = vpop.f32.mrf.mxu1 }
 0x1e2   : > { %v3444_v37 = vpop.f32.mrf.mxu0  ;;  %v3275_v5 = vadd.f32 %v3146_v63, %v5804_v31 }
 0x1e3   : > { %3663 = vst.msk [vmem:[%s5898_s16] sm:$0xff] %vm454_vm2, %v3627_v57  ;;  %v3630_v17 = vadd.f32 %v5892_v34, %v3587_v25  ;;  %v3585_v8 = vadd.f32 %v3444_v37, %v3271_v33  ;;  %v4445_v20 = vpop.f32.mrf.mxu1 }
 0x1e4   : > { %v4479_v15 = vpop.f32.mrf.mxu0  ;;  %v3280_v60 = vadd.f32 %v4445_v20, %v5807_v46 }
 0x1e5   : > { %3666 = vst.msk [vmem:[%s5898_s16 + $0x18] sm:$0xff] %vm454_vm2, %v3630_v17  ;;  %v3628_v4 = vadd.f32 %v5892_v34, %v3585_v8  ;;  %v3590_v18 = vadd.f32 %v4479_v15, %v3276_v61  ;;  %v3159_v55 = vpop.f32.mrf.mxu1 }
 0x1e6   : > { %v3457_v0 = vpop.f32.mrf.mxu0  ;;  %v3278_v31 = vadd.f32 %v3159_v55, %v5810_v13 }
 0x1e7   : > { %3664 = vst.msk [vmem:[%s5898_s16 + $0x8] sm:$0xff] %vm454_vm2, %v3628_v4  ;;  %v3633_v24 = vadd.f32 %v5892_v34, %v3590_v18  ;;  %v3588_v51 = vadd.f32 %v3457_v0, %v3274_v12  ;;  %v4446_v62 = vpop.f32.mrf.mxu1 }
 0x1e8   : > { %v4480_v54 = vpop.f32.mrf.mxu0  ;;  %v3281_v46 = vadd.f32 %v4446_v62, %v5813_v28 }
 0x1e9   : > { %3669 = vst.msk [vmem:[%s5898_s16 + $0x30] sm:$0xff] %vm454_vm2, %v3633_v24  ;;  %v3631_v45 = vadd.f32 %v5892_v34, %v3588_v51  ;;  %v3591_v30 = vadd.f32 %v4480_v54, %v3277_v27  ;;  %v3162_v56 = vpop.f32.mrf.mxu1 }
 0x1ea   : > { %v3460_v19 = vpop.f32.mrf.mxu0  ;;  %v3279_v13 = vadd.f32 %v3162_v56, %v5816_v42 }
 0x1eb   : > { %3667 = vst.msk [vmem:[%s5898_s16 + $0x20] sm:$0xff] %vm454_vm2, %v3631_v45  ;;  %v3634_v40 = vadd.f32 %v5892_v34, %v3591_v30  ;;  %v3589_v14 = vadd.f32 %v3460_v19, %v3275_v5  ;;  %v4449_v16 = vpop.f32.mrf.mxu1 }
 0x1ec   : > { %v4483_v29 = vpop.f32.mrf.mxu0  ;;  %v3284_v28 = vadd.f32 %v4449_v16, %v5819_v47 }
 0x1ed   : > { %3670 = vst.msk [vmem:[%s5898_s16 + $0x38] sm:$0xff] %vm454_vm2, %v3634_v40  ;;  %v3632_v21 = vadd.f32 %v5892_v34, %v3589_v14  ;;  %v3594_v7 = vadd.f32 %v4483_v29, %v3280_v60  ;;  %v3175_v25 = vpop.f32.mrf.mxu1 }
 0x1ee   : > { %v3473_v2 = vpop.f32.mrf.mxu0  ;;  %v3282_v42 = vadd.f32 %v3175_v25, %v5822_v11 }
 0x1ef   : > { %3668 = vst.msk [vmem:[%s5898_s16 + $0x28] sm:$0xff] %vm454_vm2, %v3632_v21  ;;  %v3637_v33 = vadd.f32 %v5892_v34, %v3594_v7  ;;  %v3592_v57 = vadd.f32 %v3473_v2, %v3278_v31  ;;  %v4450_v17 = vpop.f32.mrf.mxu1 }
 0x1f0   : > { %v4484_v58 = vpop.f32.mrf.mxu0  ;;  %v3285_v47 = vadd.f32 %v4450_v17, %v5825_v1 }
 0x1f1   : > { %3673 = vst.msk [vmem:[%s5898_s16 + $0x50] sm:$0xff] %vm454_vm2, %v3637_v33  ;;  %v3635_v37 = vadd.f32 %v5892_v34, %v3592_v57  ;;  %v3595_v61 = vadd.f32 %v4484_v58, %v3281_v46  ;;  %v3178_v12 = vpop.f32.mrf.mxu1 }
 0x1f2   : > { %v3476_v8 = vpop.f32.mrf.mxu0  ;;  %v3283_v11 = vadd.f32 %v3178_v12, %v5828_v50 }
 0x1f3   : > { %3671 = vst.msk [vmem:[%s5898_s16 + $0x40] sm:$0xff] %vm454_vm2, %v3635_v37  ;;  %v3638_v63 = vadd.f32 %v5892_v34, %v3595_v61  ;;  %v3593_v15 = vadd.f32 %v3476_v8, %v3279_v13  ;;  %v4453_v0 = vpop.f32.mrf.mxu1 }
 0x1f4   : > { %v4487_v4 = vpop.f32.mrf.mxu0  ;;  %v3288_v1 = vadd.f32 %v4453_v0, %v5831_v41 }
 0x1f5   : > { %3674 = vst.msk [vmem:[%s5898_s16 + $0x58] sm:$0xff] %vm454_vm2, %v3638_v63  ;;  %v3636_v18 = vadd.f32 %v5892_v34, %v3593_v15  ;;  %v3598_v20 = vadd.f32 %v4487_v4, %v3284_v28  ;;  %v3191_v55 = vpop.f32.mrf.mxu1 }
 0x1f6   : > { %v3489_v27 = vpop.f32.mrf.mxu0  ;;  %v3286_v50 = vadd.f32 %v3191_v55, %v5834_v52 }
 0x1f7   : > { %3672 = vst.msk [vmem:[%s5898_s16 + $0x48] sm:$0xff] %vm454_vm2, %v3636_v18  ;;  %v3641_v24 = vadd.f32 %v5892_v34, %v3598_v20  ;;  %v3596_v51 = vadd.f32 %v3489_v27, %v3282_v42  ;;  %v4454_v30 = vpop.f32.mrf.mxu1 }
 0x1f8   : > { %v4488_v54 = vpop.f32.mrf.mxu0  ;;  %v3289_v41 = vadd.f32 %v4454_v30, %v5837_v49 }
 0x1f9   : > { %3677 = vst.msk [vmem:[%s5898_s16 + $0x70] sm:$0xff] %vm454_vm2, %v3641_v24  ;;  %v3639_v5 = vadd.f32 %v5892_v34, %v3596_v51  ;;  %v3599_v45 = vadd.f32 %v4488_v54, %v3285_v47  ;;  %v3194_v40 = vpop.f32.mrf.mxu1 }
 0x1fa   : > { %v3492_v62 = vpop.f32.mrf.mxu0  ;;  %v3287_v52 = vadd.f32 %v3194_v40, %v5840_v26 }
 0x1fb   : > { %3675 = vst.msk [vmem:[%s5898_s16 + $0x60] sm:$0xff] %vm454_vm2, %v3639_v5  ;;  %v3642_v19 = vadd.f32 %v5892_v34, %v3599_v45  ;;  %v3597_v60 = vadd.f32 %v3492_v62, %v3283_v11  ;;  %v4457_v31 = vpop.f32.mrf.mxu1 }
 0x1fc   : > { %v4491_v14 = vpop.f32.mrf.mxu0  ;;  %v3292_v49 = vadd.f32 %v4457_v31, %v5843_v10 }
 0x1fd   : > { %3678 = vst.msk [vmem:[%s5898_s16 + $0x78] sm:$0xff] %vm454_vm2, %v3642_v19  ;;  %v3640_v56 = vadd.f32 %v5892_v34, %v3597_v60  ;;  %v3602_v29 = vadd.f32 %v4491_v14, %v3288_v1  ;;  %v3207_v2 = vpop.f32.mrf.mxu1 }
 0x1fe   : > { %v3505_v21 = vpop.f32.mrf.mxu0  ;;  %v3290_v26 = vadd.f32 %v3207_v2, %v5846_v3 }
 0x1ff   : > { %3676 = vst.msk [vmem:[%s5898_s16 + $0x68] sm:$0xff] %vm454_vm2, %v3640_v56  ;;  %v3645_v7 = vadd.f32 %v5892_v34, %v3602_v29  ;;  %v3600_v16 = vadd.f32 %v3505_v21, %v3286_v50  ;;  %v4458_v25 = vpop.f32.mrf.mxu1 }
 0x200   : > { %v4492_v46 = vpop.f32.mrf.mxu0  ;;  %v3293_v10 = vadd.f32 %v4458_v25, %v5849_v43 }
 0x201   : > { %3681 = vst.msk [vmem:[%s5898_s16 + $0x90] sm:$0xff] %vm454_vm2, %v3645_v7  ;;  %v3643_v33 = vadd.f32 %v5892_v34, %v3600_v16  ;;  %v3603_v57 = vadd.f32 %v4492_v46, %v3289_v41  ;;  %v3210_v61 = vpop.f32.mrf.mxu1 }
 0x202   : > { %v3508_v58 = vpop.f32.mrf.mxu0  ;;  %v3291_v3 = vadd.f32 %v3210_v61, %v5852_v32 }
 0x203   : > { %3679 = vst.msk [vmem:[%s5898_s16 + $0x80] sm:$0xff] %vm454_vm2, %v3643_v33  ;;  %v3646_v13 = vadd.f32 %v5892_v34, %v3603_v57  ;;  %v3601_v37 = vadd.f32 %v3508_v58, %v3287_v52  ;;  %v4461_v63 = vpop.f32.mrf.mxu1 }
 0x204   : > { %v4495_v17 = vpop.f32.mrf.mxu0  ;;  %v3296_v43 = vadd.f32 %v4461_v63, %v5855_v9 }
 0x205   : > { %3682 = vst.msk [vmem:[%s5898_s16 + $0x98] sm:$0xff] %vm454_vm2, %v3646_v13  ;;  %v3644_v8 = vadd.f32 %v5892_v34, %v3601_v37  ;;  %v3606_v28 = vadd.f32 %v4495_v17, %v3292_v49  ;;  %v3223_v42 = vpop.f32.mrf.mxu1 }
 0x206   : > { %v3521_v15 = vpop.f32.mrf.mxu0  ;;  %v3294_v32 = vadd.f32 %v3223_v42, %v5858_v38 }
 0x207   : > { %3680 = vst.msk [vmem:[%s5898_s16 + $0x88] sm:$0xff] %vm454_vm2, %v3644_v8  ;;  %v3649_v12 = vadd.f32 %v5892_v34, %v3606_v28  ;;  %v3604_v4 = vadd.f32 %v3521_v15, %v3290_v26  ;;  %v4462_v27 = vpop.f32.mrf.mxu1 }
 0x208   : > { %v4496_v18 = vpop.f32.mrf.mxu0  ;;  %v3297_v9 = vadd.f32 %v4462_v27, %v5861_v23 }
 0x209   : > { %3685 = vst.msk [vmem:[%s5898_s16 + $0xb0] sm:$0xff] %vm454_vm2, %v3649_v12  ;;  %v3647_v20 = vadd.f32 %v5892_v34, %v3604_v4  ;;  %v3607_v0 = vadd.f32 %v4496_v18, %v3293_v10  ;;  %v3226_v55 = vpop.f32.mrf.mxu1 }
 0x20a   : > { %v3524_v47 = vpop.f32.mrf.mxu0  ;;  %v3295_v38 = vadd.f32 %v3226_v55, %v5864_v53 }
 0x20b   : > { %3683 = vst.msk [vmem:[%s5898_s16 + $0xa0] sm:$0xff] %vm454_vm2, %v3647_v20  ;;  %v3650_v24 = vadd.f32 %v5892_v34, %v3607_v0  ;;  %v3605_v51 = vadd.f32 %v3524_v47, %v3291_v3  ;;  %v4465_v45 = vpop.f32.mrf.mxu1 }
 0x20c   : > { %v4499_v54 = vpop.f32.mrf.mxu0  ;;  %v3300_v23 = vadd.f32 %v4465_v45, %v5867_v36 }
 0x20d   : > { %3686 = vst.msk [vmem:[%s5898_s16 + $0xb8] sm:$0xff] %vm454_vm2, %v3650_v24  ;;  %v3648_v11 = vadd.f32 %v5892_v34, %v3605_v51  ;;  %v3610_v5 = vadd.f32 %v4499_v54, %v3296_v43  ;;  %v3239_v19 = vpop.f32.mrf.mxu1 }
 0x20e   : > { %v3537_v30 = vpop.f32.mrf.mxu0  ;;  %v3298_v53 = vadd.f32 %v3239_v19, %v5870_v35 }
 0x20f   : > { %3684 = vst.msk [vmem:[%s5898_s16 + $0xa8] sm:$0xff] %vm454_vm2, %v3648_v11  ;;  %v3653_v62 = vadd.f32 %v5892_v34, %v3610_v5  ;;  %v3608_v1 = vadd.f32 %v3537_v30, %v3294_v32  ;;  %v4466_v50 = vpop.f32.mrf.mxu1 }
 0x210   : > { %v4500_v60 = vpop.f32.mrf.mxu0  ;;  %v3301_v36 = vadd.f32 %v4466_v50, %v5873_v44 }
 0x211   : > { %3689 = vst.msk [vmem:[%s5898_s16 + $0xd0] sm:$0xff] %vm454_vm2, %v3653_v62  ;;  %v3651_v40 = vadd.f32 %v5892_v34, %v3608_v1  ;;  %v3611_v14 = vadd.f32 %v4500_v60, %v3297_v9  ;;  %v3242_v21 = vpop.f32.mrf.mxu1 }
 0x212   : > { %v3540_v56 = vpop.f32.mrf.mxu0  ;;  %v3299_v35 = vadd.f32 %v3242_v21, %v5876_v6 }
 0x213   : > { %3687 = vst.msk [vmem:[%s5898_s16 + $0xc0] sm:$0xff] %vm454_vm2, %v3651_v40  ;;  %v3654_v29 = vadd.f32 %v5892_v34, %v3611_v14  ;;  %v3609_v31 = vadd.f32 %v3540_v56, %v3295_v38  ;;  %v4469_v2 = vpop.f32.mrf.mxu1 }
 0x214   : > { %v4503_v41 = vpop.f32.mrf.mxu0  ;;  %v3304_v44 = vadd.f32 %v4469_v2, %v5879_v22 }
 0x215   : > { %3690 = vst.msk [vmem:[%s5898_s16 + $0xd8] sm:$0xff] %vm454_vm2, %v3654_v29  ;;  %v3652_v7 = vadd.f32 %v5892_v34, %v3609_v31  ;;  %v3614_v16 = vadd.f32 %v4503_v41, %v3300_v23  ;;  %v3255_v57 = vpop.f32.mrf.mxu1 }
 0x216   : > { %v3553_v46 = vpop.f32.mrf.mxu0  ;;  %v3302_v8 = vadd.f32 %v3255_v57, %v5881_v39 }
 0x217   : > { %3688 = vst.msk [vmem:[%s5898_s16 + $0xc8] sm:$0xff] %vm454_vm2, %v3652_v7  ;;  %v3657_v52 = vadd.f32 %v5892_v34, %v3614_v16  ;;  %v3612_v33 = vadd.f32 %v3553_v46, %v3298_v53  ;;  %v4470_v13 = vpop.f32.mrf.mxu1 }
 0x218   : > { %v4504_v25 = vpop.f32.mrf.mxu0  ;;  %v3305_v22 = vadd.f32 %v4470_v13, %v5883_v59 }
 0x219   : > { %3693 = vst.msk [vmem:[%s5898_s16 + $0xf0] sm:$0xff] %vm454_vm2, %v3657_v52  ;;  %v3655_v58 = vadd.f32 %v5892_v34, %v3612_v33  ;;  %v3615_v49 = vadd.f32 %v4504_v25, %v3301_v36  ;;  %v3258_v63 = vpop.f32.mrf.mxu1 }
 0x21a   : > { %v3556_v37 = vpop.f32.mrf.mxu0  ;;  %v3303_v39 = vadd.f32 %v3258_v63, %v5887_v48 }
 0x21b   : > { %3691 = vst.msk [vmem:[%s5898_s16 + $0xe0] sm:$0xff] %vm454_vm2, %v3655_v58  ;;  %v3658_v61 = vadd.f32 %v5892_v34, %v3615_v49  ;;  %v3613_v17 = vadd.f32 %v3556_v37, %v3299_v35 }
 0x21c   : > { %v4507_v26 = vpop.f32.mrf.mxu0 }
 0x21d   : > { %3694 = vst.msk [vmem:[%s5898_s16 + $0xf8] sm:$0xff] %vm454_vm2, %v3658_v61  ;;  %v3656_v6 = vadd.f32 %v5892_v34, %v3613_v17  ;;  %v3618_v28 = vadd.f32 %v4507_v26, %v3304_v44 }
 0x21e   : > { %v3569_v15 = vpop.f32.mrf.mxu0 }
 0x21f   : > { %3692 = vst.msk [vmem:[%s5898_s16 + $0xe8] sm:$0xff] %vm454_vm2, %v3656_v6  ;;  %v3661_v10 = vadd.f32 %v5892_v34, %v3618_v28  ;;  %v3616_v12 = vadd.f32 %v3569_v15, %v3302_v8 }
 0x220   : > { %v4508_v4 = vpop.f32.mrf.mxu0 }
 0x221   : > { %3697 = vst.msk [vmem:[%s5898_s16 + $0x110] sm:$0xff] %vm454_vm2, %v3661_v10  ;;  %v3659_v42 = vadd.f32 %v5892_v34, %v3616_v12  ;;  %v3619_v18 = vadd.f32 %v4508_v4, %v3305_v22 }
 0x222   : > { %v3572_v3 = vpop.f32.mrf.mxu0 }
 0x223   : > { %3695 = vst.msk [vmem:[%s5898_s16 + $0x100] sm:$0xff] %vm454_vm2, %v3659_v42  ;;  %v3662_v20 = vadd.f32 %v5892_v34, %v3619_v18  ;;  %v3617_v0 = vadd.f32 %v3572_v3, %v3303_v39 }
 0x225   : > { %3698 = vst.msk [vmem:[%s5898_s16 + $0x118] sm:$0xff] %vm454_vm2, %v3662_v20  ;;  %v3660_v59 = vadd.f32 %v5892_v34, %v3617_v0 }
 0x227   : > { %3696 = vst.msk [vmem:[%s5898_s16 + $0x108] sm:$0xff] %vm454_vm2, %v3660_v59 }
 0x228 PF: > { %s13_s12 = sadd.s32 1, %s4599_s12  }
 0x229   : > { %p10_p4 = scmp.ge.s32.totalorder %s13_s12, 4  }
 0x22b   :  { %12 = sbr.rel (!%p10_p4) target bundleno = 1 (0x1), region = 70 }

</bundles_post_ra>
